<compile_context>
chip_gen: v5e
topology: v5e:2x2
jax: 0.10.0
libtpu: 0.0.40
codegen_flags: <defaults>
</compile_context>

<pallas_src>
import jax
import jax.numpy as jnp
from jax.experimental import pallas as pl
from jax.experimental.pallas import tpu as pltpu

K = 5            # conv kernel size
PAD = 2          # conv padding
_VMEM_LIMIT = 32 * 1024 * 1024          # bytes; blocks sized well below this
_TARGET_BLOCK_BYTES = 2 * 1024 * 1024   # per-stream block budget


# ---------------------------------------------------------------------------
# Kernel 1: channel-wise mean / max descriptors (lane-dense, spatially tiled).
# ---------------------------------------------------------------------------
def _descriptor_kernel(x_ref, desc_ref):
    """x_ref: (1, C, T)   desc_ref: (1, 2, T) float32."""
    xs = x_ref[0].astype(jnp.float32)                          # (C, T)
    desc_ref[0, 0:1, :] = jnp.mean(xs, axis=0, keepdims=True)  # (1, T)
    desc_ref[0, 1:2, :] = jnp.max(xs, axis=0, keepdims=True)   # (1, T)


# ---------------------------------------------------------------------------
# Kernel 2: 5x5 conv (2 -> 1 channels, no bias) + sigmoid, one batch per step.
# ---------------------------------------------------------------------------
def _attention_kernel(w_ref, dpad_ref, att_ref):
    """w_ref: SMEM (2*K*K,), dpad_ref: (1, 2, H+4, W+4), att_ref: (1, H, W)."""
    H = att_ref.shape[1]
    W = att_ref.shape[2]
    # Hoist the 50 scalar weight reads out of the unrolled tap loop.
    w = [w_ref[i] for i in range(2 * K * K)]
    acc = jnp.zeros((H, W), jnp.float32)
    for c in range(2):
        for dy in range(K):
            band = dpad_ref[0, c, dy:dy + H, :]                # (H, W + 2*PAD)
            base = (c * K + dy) * K
            for dx in range(K):
                acc = acc + w[base + dx] * band[:, dx:dx + W]
    att_ref[0] = jax.nn.sigmoid(acc)


# ---------------------------------------------------------------------------
# Kernel 3: fused epilogue out = att * x + df (lane-dense, spatially tiled).
# ---------------------------------------------------------------------------
def _epilogue_kernel(att_ref, x_ref, df_ref, out_ref):
    """att_ref: (1, 1, T) f32, x/df/out: (1, C, T) in the model dtype."""
    scale = att_ref[0].astype(x_ref.dtype)                     # (1, T)
    out_ref[0] = scale * x_ref[0] + df_ref[0]                  # broadcast over C


def _pick_spatial_tile(hw, c, itemsize):
    """Pick a lane-dense spatial tile T.

    Prefers the largest 128-multiple under the per-stream block budget that
    divides hw exactly (no masked tail); otherwise returns an aligned tile and
    lets Pallas mask the final partial block.  Tiny maps use the full extent.
    """
    if hw <= 256:
        return hw
    budget_t = max(128, _TARGET_BLOCK_BYTES // max(1, c * itemsize))
    t_max = min((budget_t // 128) * 128, ((hw + 127) // 128) * 128)
    t_max = max(t_max, 128)
    for cand in range(t_max, 127, -128):
        if hw % cand == 0:
            return cand
    return t_max  # non-dividing; Pallas masks the tail block


@jax.jit
def rlm_forward(x, df, conv_weight):
    """x, df: (B, C, H, W).  conv_weight: (1, 2, K, K)."""
    B, C, H, W = x.shape
    HW = H * W
    Hp, Wp = H + 2 * PAD, W + 2 * PAD
    itemsize = jnp.dtype(x.dtype).itemsize
    T = _pick_spatial_tile(HW, C, itemsize)
    n_t = pl.cdiv(HW, T)

    # Lane-dense layout plumbing done in the wrapper (free metadata reshapes).
    x_flat = x.reshape(B, C, HW)
    df_flat = df.reshape(B, C, HW)
    w_flat = conv_weight.reshape(-1).astype(jnp.float32)       # (2*K*K,)

    # --- Kernel 1: (B, 2, HW) channel mean / max descriptors -----------------
    desc = pl.pallas_call(
        _descriptor_kernel,
        out_shape=jax.ShapeDtypeStruct((B, 2, HW), jnp.float32),
        grid_spec=pltpu.PrefetchScalarGridSpec(
            num_scalar_prefetch=0,
            grid=(B, n_t),
            in_specs=[pl.BlockSpec((1, C, T), lambda b, t: (b, 0, t))],
            out_specs=pl.BlockSpec((1, 2, T), lambda b, t: (b, 0, t)),
        ),
        compiler_params=pltpu.CompilerParams(
            dimension_semantics=("parallel", "parallel"),
            vmem_limit_bytes=_VMEM_LIMIT,
        ),
        cost_estimate=pl.CostEstimate(
            flops=2 * B * C * HW,
            transcendentals=0,
            bytes_accessed=B * C * HW * itemsize + B * 2 * HW * 4,
        ),
    )(x_flat)

    # Zero-pad the tiny 2-channel descriptor once, in the wrapper (avoids
    # re-zeroing a padded VMEM scratch and misaligned interior writes).
    dpad = jnp.pad(
        desc.reshape(B, 2, H, W),
        ((0, 0), (0, 0), (PAD, PAD), (PAD, PAD)),
    )

    # --- Kernel 2: 5x5 conv + sigmoid -> (B, H, W) attention map -------------
    att = pl.pallas_call(
        _attention_kernel,
        out_shape=jax.ShapeDtypeStruct((B, H, W), jnp.float32),
        grid_spec=pltpu.PrefetchScalarGridSpec(
            num_scalar_prefetch=0,
            grid=(B,),
            in_specs=[
                pl.BlockSpec(memory_space=pltpu.MemorySpace.SMEM),   # conv weights
                pl.BlockSpec((1, 2, Hp, Wp), lambda b: (b, 0, 0, 0)),
            ],
            out_specs=pl.BlockSpec((1, H, W), lambda b: (b, 0, 0)),
        ),
        compiler_params=pltpu.CompilerParams(
            dimension_semantics=("parallel",),
            vmem_limit_bytes=_VMEM_LIMIT,
        ),
        cost_estimate=pl.CostEstimate(
            flops=2 * (2 * K * K) * B * HW,
            transcendentals=B * HW,
            bytes_accessed=B * 2 * Hp * Wp * 4 + B * HW * 4,
        ),
    )(w_flat, dpad)

    # --- Kernel 3: fused epilogue out = att * x + df (lane dense) ------------
    att_flat = att.reshape(B, 1, HW)
    out_flat = pl.pallas_call(
        _epilogue_kernel,
        out_shape=jax.ShapeDtypeStruct((B, C, HW), x.dtype),
        grid_spec=pltpu.PrefetchScalarGridSpec(
            num_scalar_prefetch=0,
            grid=(B, n_t),
            in_specs=[
                pl.BlockSpec((1, 1, T), lambda b, t: (b, 0, t)),   # attention
                pl.BlockSpec((1, C, T), lambda b, t: (b, 0, t)),   # x
                pl.BlockSpec((1, C, T), lambda b, t: (b, 0, t)),   # df
            ],
            out_specs=pl.BlockSpec((1, C, T), lambda b, t: (b, 0, t)),
        ),
        compiler_params=pltpu.CompilerParams(
            dimension_semantics=("parallel", "parallel"),
            vmem_limit_bytes=_VMEM_LIMIT,
        ),
        cost_estimate=pl.CostEstimate(
            flops=2 * B * C * HW,
            transcendentals=0,
            bytes_accessed=3 * B * C * HW * itemsize + B * HW * 4,
        ),
    )(att_flat, x_flat, df_flat)

    return out_flat.reshape(B, C, H, W)


def rlm_reference(x, df, conv_weight):
    """Pure-JAX reference mirroring the PyTorch module."""
    avg = jnp.mean(x, axis=1, keepdims=True)
    mx = jnp.max(x, axis=1, keepdims=True)
    cat = jnp.concatenate([avg, mx], axis=1)                   # (B, 2, H, W)
    conv = jax.lax.conv_general_dilated(
        cat, conv_weight,
        window_strides=(1, 1),
        padding=((PAD, PAD), (PAD, PAD)),
        dimension_numbers=("NCHW", "OIHW", "NCHW"),
    )                                                          # (B, 1, H, W)
    att = jax.nn.sigmoid(conv)
    return att * x + df


if __name__ == "__main__":
    key = jax.random.PRNGKey(0)
    k_x, k_df, k_w = jax.random.split(key, 3)

    B, C, H, W = 2, 4, 16, 16
    x = jax.random.normal(k_x, (B, C, H, W), dtype=jnp.float32)
    df = jax.random.normal(k_df, (B, C, H, W), dtype=jnp.float32)
    # Conv2d(2 -> 1, kernel_size=5, bias=False) weight.
    conv_weight = 0.1 * jax.random.normal(k_w, (1, 2, K, K), dtype=jnp.float32)

    out = rlm_forward(x, df, conv_weight)
    out = jax.block_until_ready(out)

    ref = rlm_reference(x, df, conv_weight)
    assert out.shape == (B, C, H, W)
    err = jnp.max(jnp.abs(out - ref))
    assert jnp.allclose(out, ref, atol=1e-5, rtol=1e-5), f"max abs err = {err}"
    print("KERNEL_OK")
</pallas_src>

<mosaic_0001>
module attributes {stable_mosaic.version = 11 : i64} {
  func.func @_descriptor_kernel(%arg0: i32, %arg1: i32, %arg2: memref<1x4x256xf32, #tpu.memory_space<vmem>>, %arg3: memref<1x2x256xf32, #tpu.memory_space<vmem>>) attributes {dimension_semantics = [#tpu.dimension_semantics<parallel>, #tpu.dimension_semantics<parallel>], iteration_bounds = array<i64: 2, 1>, scalar_prefetch = 0 : i64, scratch_operands = 0 : i64, tpu.core_type = #tpu.core_type<tc>, window_params = [{transform_indices = @transform_0, window_bounds = array<i64: 1, 4, 256>}, {transform_indices = @transform_1, window_bounds = array<i64: 1, 2, 256>}]} {
    %c0 = arith.constant 0 : index
    %c0_0 = arith.constant 0 : index
    %c0_1 = arith.constant 0 : index
    %0 = vector.load %arg2[%c0, %c0_0, %c0_1] : memref<1x4x256xf32, #tpu.memory_space<vmem>>, vector<1x4x256xf32>
    %1 = vector.shape_cast %0 : vector<1x4x256xf32> to vector<4x256xf32>
    %cst = arith.constant dense<0.000000e+00> : vector<256xf32>
    %2 = vector.multi_reduction <add>, %1, %cst [0] : vector<4x256xf32> to vector<256xf32>
    %3 = vector.shape_cast %2 : vector<256xf32> to vector<1x256xf32>
    %cst_2 = arith.constant 4.000000e+00 : f32
    %4 = vector.broadcast %cst_2 : f32 to vector<1x256xf32>
    %5 = arith.divf %3, %4 : vector<1x256xf32>
    %c0_3 = arith.constant 0 : index
    %c0_4 = arith.constant 0 : index
    %c0_5 = arith.constant 0 : index
    %6 = vector.load %arg3[%c0_3, %c0_4, %c0_5] : memref<1x2x256xf32, #tpu.memory_space<vmem>>, vector<1x1x256xf32>
    %7 = vector.shape_cast %6 : vector<1x1x256xf32> to vector<1x256xf32>
    %8 = vector.shape_cast %5 : vector<1x256xf32> to vector<1x1x256xf32>
    tpu.vector_store %arg3[%c0_3, %c0_4, %c0_5], %8 {strides = array<i32>} : memref<1x2x256xf32, #tpu.memory_space<vmem>>, vector<1x1x256xf32>,
    %cst_6 = arith.constant dense<0xFF800000> : vector<256xf32>
    %9 = vector.multi_reduction <maximumf>, %1, %cst_6 [0] : vector<4x256xf32> to vector<256xf32>
    %10 = vector.shape_cast %9 : vector<256xf32> to vector<1x256xf32>
    %c0_7 = arith.constant 0 : index
    %c1 = arith.constant 1 : index
    %c0_8 = arith.constant 0 : index
    %11 = vector.load %arg3[%c0_7, %c1, %c0_8] : memref<1x2x256xf32, #tpu.memory_space<vmem>>, vector<1x1x256xf32>
    %12 = vector.shape_cast %11 : vector<1x1x256xf32> to vector<1x256xf32>
    %13 = vector.shape_cast %10 : vector<1x256xf32> to vector<1x1x256xf32>
    tpu.vector_store %arg3[%c0_7, %c1, %c0_8], %13 {strides = array<i32>} : memref<1x2x256xf32, #tpu.memory_space<vmem>>, vector<1x1x256xf32>,
    return
  }
  func.func @transform_0(%arg0: i32, %arg1: i32) -> (i32, i32, i32) {
    %c0_i32 = arith.constant 0 : i32
    %c0_i32_0 = arith.constant 0 : i32
    return %arg0, %c0_i32, %arg1 : i32, i32, i32
  }
  func.func @transform_1(%arg0: i32, %arg1: i32) -> (i32, i32, i32) {
    %c0_i32 = arith.constant 0 : i32
    %c0_i32_0 = arith.constant 0 : i32
    return %arg0, %c0_i32, %arg1 : i32, i32, i32
  }
}

module attributes {stable_mosaic.version = 11 : i64} {
  func.func @_attention_kernel(%arg0: i32, %arg1: memref<50xf32, #tpu.memory_space<smem>>, %arg2: memref<1x2x20x20xf32, #tpu.memory_space<vmem>>, %arg3: memref<1x16x16xf32, #tpu.memory_space<vmem>>) attributes {dimension_semantics = [#tpu.dimension_semantics<parallel>], iteration_bounds = array<i64: 2>, scalar_prefetch = 0 : i64, scratch_operands = 0 : i64, tpu.core_type = #tpu.core_type<tc>, window_params = [{transform_indices = @transform_0, window_bounds = array<i64: 50>}, {transform_indices = @transform_1, window_bounds = array<i64: 1, 2, 20, 20>}, {transform_indices = @transform_2, window_bounds = array<i64: 1, 16, 16>}]} {
    %c0 = arith.constant 0 : index
    %0 = memref.load %arg1[%c0] : memref<50xf32, #tpu.memory_space<smem>>
    %c1 = arith.constant 1 : index
    %1 = memref.load %arg1[%c1] : memref<50xf32, #tpu.memory_space<smem>>
    %c2 = arith.constant 2 : index
    %2 = memref.load %arg1[%c2] : memref<50xf32, #tpu.memory_space<smem>>
    %c3 = arith.constant 3 : index
    %3 = memref.load %arg1[%c3] : memref<50xf32, #tpu.memory_space<smem>>
    %c4 = arith.constant 4 : index
    %4 = memref.load %arg1[%c4] : memref<50xf32, #tpu.memory_space<smem>>
    %c5 = arith.constant 5 : index
    %5 = memref.load %arg1[%c5] : memref<50xf32, #tpu.memory_space<smem>>
    %c6 = arith.constant 6 : index
    %6 = memref.load %arg1[%c6] : memref<50xf32, #tpu.memory_space<smem>>
    %c7 = arith.constant 7 : index
    %7 = memref.load %arg1[%c7] : memref<50xf32, #tpu.memory_space<smem>>
    %c8 = arith.constant 8 : index
    %8 = memref.load %arg1[%c8] : memref<50xf32, #tpu.memory_space<smem>>
    %c9 = arith.constant 9 : index
    %9 = memref.load %arg1[%c9] : memref<50xf32, #tpu.memory_space<smem>>
    %c10 = arith.constant 10 : index
    %10 = memref.load %arg1[%c10] : memref<50xf32, #tpu.memory_space<smem>>
    %c11 = arith.constant 11 : index
    %11 = memref.load %arg1[%c11] : memref<50xf32, #tpu.memory_space<smem>>
    %c12 = arith.constant 12 : index
    %12 = memref.load %arg1[%c12] : memref<50xf32, #tpu.memory_space<smem>>
    %c13 = arith.constant 13 : index
    %13 = memref.load %arg1[%c13] : memref<50xf32, #tpu.memory_space<smem>>
    %c14 = arith.constant 14 : index
    %14 = memref.load %arg1[%c14] : memref<50xf32, #tpu.memory_space<smem>>
    %c15 = arith.constant 15 : index
    %15 = memref.load %arg1[%c15] : memref<50xf32, #tpu.memory_space<smem>>
    %c16 = arith.constant 16 : index
    %16 = memref.load %arg1[%c16] : memref<50xf32, #tpu.memory_space<smem>>
    %c17 = arith.constant 17 : index
    %17 = memref.load %arg1[%c17] : memref<50xf32, #tpu.memory_space<smem>>
    %c18 = arith.constant 18 : index
    %18 = memref.load %arg1[%c18] : memref<50xf32, #tpu.memory_space<smem>>
    %c19 = arith.constant 19 : index
    %19 = memref.load %arg1[%c19] : memref<50xf32, #tpu.memory_space<smem>>
    %c20 = arith.constant 20 : index
    %20 = memref.load %arg1[%c20] : memref<50xf32, #tpu.memory_space<smem>>
    %c21 = arith.constant 21 : index
    %21 = memref.load %arg1[%c21] : memref<50xf32, #tpu.memory_space<smem>>
    %c22 = arith.constant 22 : index
    %22 = memref.load %arg1[%c22] : memref<50xf32, #tpu.memory_space<smem>>
    %c23 = arith.constant 23 : index
    %23 = memref.load %arg1[%c23] : memref<50xf32, #tpu.memory_space<smem>>
    %c24 = arith.constant 24 : index
    %24 = memref.load %arg1[%c24] : memref<50xf32, #tpu.memory_space<smem>>
    %c25 = arith.constant 25 : index
    %25 = memref.load %arg1[%c25] : memref<50xf32, #tpu.memory_space<smem>>
    %c26 = arith.constant 26 : index
    %26 = memref.load %arg1[%c26] : memref<50xf32, #tpu.memory_space<smem>>
    %c27 = arith.constant 27 : index
    %27 = memref.load %arg1[%c27] : memref<50xf32, #tpu.memory_space<smem>>
    %c28 = arith.constant 28 : index
    %28 = memref.load %arg1[%c28] : memref<50xf32, #tpu.memory_space<smem>>
    %c29 = arith.constant 29 : index
    %29 = memref.load %arg1[%c29] : memref<50xf32, #tpu.memory_space<smem>>
    %c30 = arith.constant 30 : index
    %30 = memref.load %arg1[%c30] : memref<50xf32, #tpu.memory_space<smem>>
    %c31 = arith.constant 31 : index
    %31 = memref.load %arg1[%c31] : memref<50xf32, #tpu.memory_space<smem>>
    %c32 = arith.constant 32 : index
    %32 = memref.load %arg1[%c32] : memref<50xf32, #tpu.memory_space<smem>>
    %c33 = arith.constant 33 : index
    %33 = memref.load %arg1[%c33] : memref<50xf32, #tpu.memory_space<smem>>
    %c34 = arith.constant 34 : index
    %34 = memref.load %arg1[%c34] : memref<50xf32, #tpu.memory_space<smem>>
    %c35 = arith.constant 35 : index
    %35 = memref.load %arg1[%c35] : memref<50xf32, #tpu.memory_space<smem>>
    %c36 = arith.constant 36 : index
    %36 = memref.load %arg1[%c36] : memref<50xf32, #tpu.memory_space<smem>>
    %c37 = arith.constant 37 : index
    %37 = memref.load %arg1[%c37] : memref<50xf32, #tpu.memory_space<smem>>
    %c38 = arith.constant 38 : index
    %38 = memref.load %arg1[%c38] : memref<50xf32, #tpu.memory_space<smem>>
    %c39 = arith.constant 39 : index
    %39 = memref.load %arg1[%c39] : memref<50xf32, #tpu.memory_space<smem>>
    %c40 = arith.constant 40 : index
    %40 = memref.load %arg1[%c40] : memref<50xf32, #tpu.memory_space<smem>>
    %c41 = arith.constant 41 : index
    %41 = memref.load %arg1[%c41] : memref<50xf32, #tpu.memory_space<smem>>
    %c42 = arith.constant 42 : index
    %42 = memref.load %arg1[%c42] : memref<50xf32, #tpu.memory_space<smem>>
    %c43 = arith.constant 43 : index
    %43 = memref.load %arg1[%c43] : memref<50xf32, #tpu.memory_space<smem>>
    %c44 = arith.constant 44 : index
    %44 = memref.load %arg1[%c44] : memref<50xf32, #tpu.memory_space<smem>>
    %c45 = arith.constant 45 : index
    %45 = memref.load %arg1[%c45] : memref<50xf32, #tpu.memory_space<smem>>
    %c46 = arith.constant 46 : index
    %46 = memref.load %arg1[%c46] : memref<50xf32, #tpu.memory_space<smem>>
    %c47 = arith.constant 47 : index
    %47 = memref.load %arg1[%c47] : memref<50xf32, #tpu.memory_space<smem>>
    %c48 = arith.constant 48 : index
    %48 = memref.load %arg1[%c48] : memref<50xf32, #tpu.memory_space<smem>>
    %c49 = arith.constant 49 : index
    %49 = memref.load %arg1[%c49] : memref<50xf32, #tpu.memory_space<smem>>
    %cst = arith.constant 0.000000e+00 : f32
    %50 = vector.broadcast %cst : f32 to vector<16x16xf32>
    %c0_0 = arith.constant 0 : index
    %c0_1 = arith.constant 0 : index
    %c0_2 = arith.constant 0 : index
    %c0_3 = arith.constant 0 : index
    %51 = vector.load %arg2[%c0_0, %c0_1, %c0_2, %c0_3] : memref<1x2x20x20xf32, #tpu.memory_space<vmem>>, vector<1x1x16x20xf32>
    %52 = vector.shape_cast %51 : vector<1x1x16x20xf32> to vector<16x20xf32>
    %53 = vector.extract_strided_slice %52 {offsets = [0, 0], sizes = [16, 16], strides = [1, 1]} : vector<16x20xf32> to vector<16x16xf32>
    %54 = vector.broadcast %0 : f32 to vector<16x16xf32>
    %55 = arith.mulf %54, %53 : vector<16x16xf32>
    %56 = arith.addf %50, %55 : vector<16x16xf32>
    %57 = vector.extract_strided_slice %52 {offsets = [0, 1], sizes = [16, 16], strides = [1, 1]} : vector<16x20xf32> to vector<16x16xf32>
    %58 = vector.broadcast %1 : f32 to vector<16x16xf32>
    %59 = arith.mulf %58, %57 : vector<16x16xf32>
    %60 = arith.addf %56, %59 : vector<16x16xf32>
    %61 = vector.extract_strided_slice %52 {offsets = [0, 2], sizes = [16, 16], strides = [1, 1]} : vector<16x20xf32> to vector<16x16xf32>
    %62 = vector.broadcast %2 : f32 to vector<16x16xf32>
    %63 = arith.mulf %62, %61 : vector<16x16xf32>
    %64 = arith.addf %60, %63 : vector<16x16xf32>
    %65 = vector.extract_strided_slice %52 {offsets = [0, 3], sizes = [16, 16], strides = [1, 1]} : vector<16x20xf32> to vector<16x16xf32>
    %66 = vector.broadcast %3 : f32 to vector<16x16xf32>
    %67 = arith.mulf %66, %65 : vector<16x16xf32>
    %68 = arith.addf %64, %67 : vector<16x16xf32>
    %69 = vector.extract_strided_slice %52 {offsets = [0, 4], sizes = [16, 16], strides = [1, 1]} : vector<16x20xf32> to vector<16x16xf32>
    %70 = vector.broadcast %4 : f32 to vector<16x16xf32>
    %71 = arith.mulf %70, %69 : vector<16x16xf32>
    %72 = arith.addf %68, %71 : vector<16x16xf32>
    %c0_4 = arith.constant 0 : index
    %c0_5 = arith.constant 0 : index
    %c1_6 = arith.constant 1 : index
    %c0_7 = arith.constant 0 : index
    %73 = vector.load %arg2[%c0_4, %c0_5, %c1_6, %c0_7] : memref<1x2x20x20xf32, #tpu.memory_space<vmem>>, vector<1x1x16x20xf32>
    %74 = vector.shape_cast %73 : vector<1x1x16x20xf32> to vector<16x20xf32>
    %75 = vector.extract_strided_slice %74 {offsets = [0, 0], sizes = [16, 16], strides = [1, 1]} : vector<16x20xf32> to vector<16x16xf32>
    %76 = vector.broadcast %5 : f32 to vector<16x16xf32>
    %77 = arith.mulf %76, %75 : vector<16x16xf32>
    %78 = arith.addf %72, %77 : vector<16x16xf32>
    %79 = vector.extract_strided_slice %74 {offsets = [0, 1], sizes = [16, 16], strides = [1, 1]} : vector<16x20xf32> to vector<16x16xf32>
    %80 = vector.broadcast %6 : f32 to vector<16x16xf32>
    %81 = arith.mulf %80, %79 : vector<16x16xf32>
    %82 = arith.addf %78, %81 : vector<16x16xf32>
    %83 = vector.extract_strided_slice %74 {offsets = [0, 2], sizes = [16, 16], strides = [1, 1]} : vector<16x20xf32> to vector<16x16xf32>
    %84 = vector.broadcast %7 : f32 to vector<16x16xf32>
    %85 = arith.mulf %84, %83 : vector<16x16xf32>
    %86 = arith.addf %82, %85 : vector<16x16xf32>
    %87 = vector.extract_strided_slice %74 {offsets = [0, 3], sizes = [16, 16], strides = [1, 1]} : vector<16x20xf32> to vector<16x16xf32>
    %88 = vector.broadcast %8 : f32 to vector<16x16xf32>
    %89 = arith.mulf %88, %87 : vector<16x16xf32>
    %90 = arith.addf %86, %89 : vector<16x16xf32>
    %91 = vector.extract_strided_slice %74 {offsets = [0, 4], sizes = [16, 16], strides = [1, 1]} : vector<16x20xf32> to vector<16x16xf32>
    %92 = vector.broadcast %9 : f32 to vector<16x16xf32>
    %93 = arith.mulf %92, %91 : vector<16x16xf32>
    %94 = arith.addf %90, %93 : vector<16x16xf32>
    %c0_8 = arith.constant 0 : index
    %c0_9 = arith.constant 0 : index
    %c2_10 = arith.constant 2 : index
    %c0_11 = arith.constant 0 : index
    %95 = vector.load %arg2[%c0_8, %c0_9, %c2_10, %c0_11] : memref<1x2x20x20xf32, #tpu.memory_space<vmem>>, vector<1x1x16x20xf32>
    %96 = vector.shape_cast %95 : vector<1x1x16x20xf32> to vector<16x20xf32>
    %97 = vector.extract_strided_slice %96 {offsets = [0, 0], sizes = [16, 16], strides = [1, 1]} : vector<16x20xf32> to vector<16x16xf32>
    %98 = vector.broadcast %10 : f32 to vector<16x16xf32>
    %99 = arith.mulf %98, %97 : vector<16x16xf32>
    %100 = arith.addf %94, %99 : vector<16x16xf32>
    %101 = vector.extract_strided_slice %96 {offsets = [0, 1], sizes = [16, 16], strides = [1, 1]} : vector<16x20xf32> to vector<16x16xf32>
    %102 = vector.broadcast %11 : f32 to vector<16x16xf32>
    %103 = arith.mulf %102, %101 : vector<16x16xf32>
    %104 = arith.addf %100, %103 : vector<16x16xf32>
    %105 = vector.extract_strided_slice %96 {offsets = [0, 2], sizes = [16, 16], strides = [1, 1]} : vector<16x20xf32> to vector<16x16xf32>
    %106 = vector.broadcast %12 : f32 to vector<16x16xf32>
    %107 = arith.mulf %106, %105 : vector<16x16xf32>
    %108 = arith.addf %104, %107 : vector<16x16xf32>
    %109 = vector.extract_strided_slice %96 {offsets = [0, 3], sizes = [16, 16], strides = [1, 1]} : vector<16x20xf32> to vector<16x16xf32>
    %110 = vector.broadcast %13 : f32 to vector<16x16xf32>
    %111 = arith.mulf %110, %109 : vector<16x16xf32>
    %112 = arith.addf %108, %111 : vector<16x16xf32>
    %113 = vector.extract_strided_slice %96 {offsets = [0, 4], sizes = [16, 16], strides = [1, 1]} : vector<16x20xf32> to vector<16x16xf32>
    %114 = vector.broadcast %14 : f32 to vector<16x16xf32>
    %115 = arith.mulf %114, %113 : vector<16x16xf32>
    %116 = arith.addf %112, %115 : vector<16x16xf32>
    %c0_12 = arith.constant 0 : index
    %c0_13 = arith.constant 0 : index
    %c3_14 = arith.constant 3 : index
    %c0_15 = arith.constant 0 : index
    %117 = vector.load %arg2[%c0_12, %c0_13, %c3_14, %c0_15] : memref<1x2x20x20xf32, #tpu.memory_space<vmem>>, vector<1x1x16x20xf32>
    %118 = vector.shape_cast %117 : vector<1x1x16x20xf32> to vector<16x20xf32>
    %119 = vector.extract_strided_slice %118 {offsets = [0, 0], sizes = [16, 16], strides = [1, 1]} : vector<16x20xf32> to vector<16x16xf32>
    %120 = vector.broadcast %15 : f32 to vector<16x16xf32>
    %121 = arith.mulf %120, %119 : vector<16x16xf32>
    %122 = arith.addf %116, %121 : vector<16x16xf32>
    %123 = vector.extract_strided_slice %118 {offsets = [0, 1], sizes = [16, 16], strides = [1, 1]} : vector<16x20xf32> to vector<16x16xf32>
    %124 = vector.broadcast %16 : f32 to vector<16x16xf32>
    %125 = arith.mulf %124, %123 : vector<16x16xf32>
    %126 = arith.addf %122, %125 : vector<16x16xf32>
    %127 = vector.extract_strided_slice %118 {offsets = [0, 2], sizes = [16, 16], strides = [1, 1]} : vector<16x20xf32> to vector<16x16xf32>
    %128 = vector.broadcast %17 : f32 to vector<16x16xf32>
    %129 = arith.mulf %128, %127 : vector<16x16xf32>
    %130 = arith.addf %126, %129 : vector<16x16xf32>
    %131 = vector.extract_strided_slice %118 {offsets = [0, 3], sizes = [16, 16], strides = [1, 1]} : vector<16x20xf32> to vector<16x16xf32>
    %132 = vector.broadcast %18 : f32 to vector<16x16xf32>
    %133 = arith.mulf %132, %131 : vector<16x16xf32>
    %134 = arith.addf %130, %133 : vector<16x16xf32>
    %135 = vector.extract_strided_slice %118 {offsets = [0, 4], sizes = [16, 16], strides = [1, 1]} : vector<16x20xf32> to vector<16x16xf32>
    %136 = vector.broadcast %19 : f32 to vector<16x16xf32>
    %137 = arith.mulf %136, %135 : vector<16x16xf32>
    %138 = arith.addf %134, %137 : vector<16x16xf32>
    %c0_16 = arith.constant 0 : index
    %c0_17 = arith.constant 0 : index
    %c4_18 = arith.constant 4 : index
    %c0_19 = arith.constant 0 : index
    %139 = vector.load %arg2[%c0_16, %c0_17, %c4_18, %c0_19] : memref<1x2x20x20xf32, #tpu.memory_space<vmem>>, vector<1x1x16x20xf32>
    %140 = vector.shape_cast %139 : vector<1x1x16x20xf32> to vector<16x20xf32>
    %141 = vector.extract_strided_slice %140 {offsets = [0, 0], sizes = [16, 16], strides = [1, 1]} : vector<16x20xf32> to vector<16x16xf32>
    %142 = vector.broadcast %20 : f32 to vector<16x16xf32>
    %143 = arith.mulf %142, %141 : vector<16x16xf32>
    %144 = arith.addf %138, %143 : vector<16x16xf32>
    %145 = vector.extract_strided_slice %140 {offsets = [0, 1], sizes = [16, 16], strides = [1, 1]} : vector<16x20xf32> to vector<16x16xf32>
    %146 = vector.broadcast %21 : f32 to vector<16x16xf32>
    %147 = arith.mulf %146, %145 : vector<16x16xf32>
    %148 = arith.addf %144, %147 : vector<16x16xf32>
    %149 = vector.extract_strided_slice %140 {offsets = [0, 2], sizes = [16, 16], strides = [1, 1]} : vector<16x20xf32> to vector<16x16xf32>
    %150 = vector.broadcast %22 : f32 to vector<16x16xf32>
    %151 = arith.mulf %150, %149 : vector<16x16xf32>
    %152 = arith.addf %148, %151 : vector<16x16xf32>
    %153 = vector.extract_strided_slice %140 {offsets = [0, 3], sizes = [16, 16], strides = [1, 1]} : vector<16x20xf32> to vector<16x16xf32>
    %154 = vector.broadcast %23 : f32 to vector<16x16xf32>
    %155 = arith.mulf %154, %153 : vector<16x16xf32>
    %156 = arith.addf %152, %155 : vector<16x16xf32>
    %157 = vector.extract_strided_slice %140 {offsets = [0, 4], sizes = [16, 16], strides = [1, 1]} : vector<16x20xf32> to vector<16x16xf32>
    %158 = vector.broadcast %24 : f32 to vector<16x16xf32>
    %159 = arith.mulf %158, %157 : vector<16x16xf32>
    %160 = arith.addf %156, %159 : vector<16x16xf32>
    %c0_20 = arith.constant 0 : index
    %c1_21 = arith.constant 1 : index
    %c0_22 = arith.constant 0 : index
    %c0_23 = arith.constant 0 : index
    %161 = vector.load %arg2[%c0_20, %c1_21, %c0_22, %c0_23] : memref<1x2x20x20xf32, #tpu.memory_space<vmem>>, vector<1x1x16x20xf32>
    %162 = vector.shape_cast %161 : vector<1x1x16x20xf32> to vector<16x20xf32>
    %163 = vector.extract_strided_slice %162 {offsets = [0, 0], sizes = [16, 16], strides = [1, 1]} : vector<16x20xf32> to vector<16x16xf32>
    %164 = vector.broadcast %25 : f32 to vector<16x16xf32>
    %165 = arith.mulf %164, %163 : vector<16x16xf32>
    %166 = arith.addf %160, %165 : vector<16x16xf32>
    %167 = vector.extract_strided_slice %162 {offsets = [0, 1], sizes = [16, 16], strides = [1, 1]} : vector<16x20xf32> to vector<16x16xf32>
    %168 = vector.broadcast %26 : f32 to vector<16x16xf32>
    %169 = arith.mulf %168, %167 : vector<16x16xf32>
    %170 = arith.addf %166, %169 : vector<16x16xf32>
    %171 = vector.extract_strided_slice %162 {offsets = [0, 2], sizes = [16, 16], strides = [1, 1]} : vector<16x20xf32> to vector<16x16xf32>
    %172 = vector.broadcast %27 : f32 to vector<16x16xf32>
    %173 = arith.mulf %172, %171 : vector<16x16xf32>
    %174 = arith.addf %170, %173 : vector<16x16xf32>
    %175 = vector.extract_strided_slice %162 {offsets = [0, 3], sizes = [16, 16], strides = [1, 1]} : vector<16x20xf32> to vector<16x16xf32>
    %176 = vector.broadcast %28 : f32 to vector<16x16xf32>
    %177 = arith.mulf %176, %175 : vector<16x16xf32>
    %178 = arith.addf %174, %177 : vector<16x16xf32>
    %179 = vector.extract_strided_slice %162 {offsets = [0, 4], sizes = [16, 16], strides = [1, 1]} : vector<16x20xf32> to vector<16x16xf32>
    %180 = vector.broadcast %29 : f32 to vector<16x16xf32>
    %181 = arith.mulf %180, %179 : vector<16x16xf32>
    %182 = arith.addf %178, %181 : vector<16x16xf32>
    %c0_24 = arith.constant 0 : index
    %c1_25 = arith.constant 1 : index
    %c1_26 = arith.constant 1 : index
    %c0_27 = arith.constant 0 : index
    %183 = vector.load %arg2[%c0_24, %c1_25, %c1_26, %c0_27] : memref<1x2x20x20xf32, #tpu.memory_space<vmem>>, vector<1x1x16x20xf32>
    %184 = vector.shape_cast %183 : vector<1x1x16x20xf32> to vector<16x20xf32>
    %185 = vector.extract_strided_slice %184 {offsets = [0, 0], sizes = [16, 16], strides = [1, 1]} : vector<16x20xf32> to vector<16x16xf32>
    %186 = vector.broadcast %30 : f32 to vector<16x16xf32>
    %187 = arith.mulf %186, %185 : vector<16x16xf32>
    %188 = arith.addf %182, %187 : vector<16x16xf32>
    %189 = vector.extract_strided_slice %184 {offsets = [0, 1], sizes = [16, 16], strides = [1, 1]} : vector<16x20xf32> to vector<16x16xf32>
    %190 = vector.broadcast %31 : f32 to vector<16x16xf32>
    %191 = arith.mulf %190, %189 : vector<16x16xf32>
    %192 = arith.addf %188, %191 : vector<16x16xf32>
    %193 = vector.extract_strided_slice %184 {offsets = [0, 2], sizes = [16, 16], strides = [1, 1]} : vector<16x20xf32> to vector<16x16xf32>
    %194 = vector.broadcast %32 : f32 to vector<16x16xf32>
    %195 = arith.mulf %194, %193 : vector<16x16xf32>
    %196 = arith.addf %192, %195 : vector<16x16xf32>
    %197 = vector.extract_strided_slice %184 {offsets = [0, 3], sizes = [16, 16], strides = [1, 1]} : vector<16x20xf32> to vector<16x16xf32>
    %198 = vector.broadcast %33 : f32 to vector<16x16xf32>
    %199 = arith.mulf %198, %197 : vector<16x16xf32>
    %200 = arith.addf %196, %199 : vector<16x16xf32>
    %201 = vector.extract_strided_slice %184 {offsets = [0, 4], sizes = [16, 16], strides = [1, 1]} : vector<16x20xf32> to vector<16x16xf32>
    %202 = vector.broadcast %34 : f32 to vector<16x16xf32>
    %203 = arith.mulf %202, %201 : vector<16x16xf32>
    %204 = arith.addf %200, %203 : vector<16x16xf32>
    %c0_28 = arith.constant 0 : index
    %c1_29 = arith.constant 1 : index
    %c2_30 = arith.constant 2 : index
    %c0_31 = arith.constant 0 : index
    %205 = vector.load %arg2[%c0_28, %c1_29, %c2_30, %c0_31] : memref<1x2x20x20xf32, #tpu.memory_space<vmem>>, vector<1x1x16x20xf32>
    %206 = vector.shape_cast %205 : vector<1x1x16x20xf32> to vector<16x20xf32>
    %207 = vector.extract_strided_slice %206 {offsets = [0, 0], sizes = [16, 16], strides = [1, 1]} : vector<16x20xf32> to vector<16x16xf32>
    %208 = vector.broadcast %35 : f32 to vector<16x16xf32>
    %209 = arith.mulf %208, %207 : vector<16x16xf32>
    %210 = arith.addf %204, %209 : vector<16x16xf32>
    %211 = vector.extract_strided_slice %206 {offsets = [0, 1], sizes = [16, 16], strides = [1, 1]} : vector<16x20xf32> to vector<16x16xf32>
    %212 = vector.broadcast %36 : f32 to vector<16x16xf32>
    %213 = arith.mulf %212, %211 : vector<16x16xf32>
    %214 = arith.addf %210, %213 : vector<16x16xf32>
    %215 = vector.extract_strided_slice %206 {offsets = [0, 2], sizes = [16, 16], strides = [1, 1]} : vector<16x20xf32> to vector<16x16xf32>
    %216 = vector.broadcast %37 : f32 to vector<16x16xf32>
    %217 = arith.mulf %216, %215 : vector<16x16xf32>
    %218 = arith.addf %214, %217 : vector<16x16xf32>
    %219 = vector.extract_strided_slice %206 {offsets = [0, 3], sizes = [16, 16], strides = [1, 1]} : vector<16x20xf32> to vector<16x16xf32>
    %220 = vector.broadcast %38 : f32 to vector<16x16xf32>
    %221 = arith.mulf %220, %219 : vector<16x16xf32>
    %222 = arith.addf %218, %221 : vector<16x16xf32>
    %223 = vector.extract_strided_slice %206 {offsets = [0, 4], sizes = [16, 16], strides = [1, 1]} : vector<16x20xf32> to vector<16x16xf32>
    %224 = vector.broadcast %39 : f32 to vector<16x16xf32>
    %225 = arith.mulf %224, %223 : vector<16x16xf32>
    %226 = arith.addf %222, %225 : vector<16x16xf32>
    %c0_32 = arith.constant 0 : index
    %c1_33 = arith.constant 1 : index
    %c3_34 = arith.constant 3 : index
    %c0_35 = arith.constant 0 : index
    %227 = vector.load %arg2[%c0_32, %c1_33, %c3_34, %c0_35] : memref<1x2x20x20xf32, #tpu.memory_space<vmem>>, vector<1x1x16x20xf32>
    %228 = vector.shape_cast %227 : vector<1x1x16x20xf32> to vector<16x20xf32>
    %229 = vector.extract_strided_slice %228 {offsets = [0, 0], sizes = [16, 16], strides = [1, 1]} : vector<16x20xf32> to vector<16x16xf32>
    %230 = vector.broadcast %40 : f32 to vector<16x16xf32>
    %231 = arith.mulf %230, %229 : vector<16x16xf32>
    %232 = arith.addf %226, %231 : vector<16x16xf32>
    %233 = vector.extract_strided_slice %228 {offsets = [0, 1], sizes = [16, 16], strides = [1, 1]} : vector<16x20xf32> to vector<16x16xf32>
    %234 = vector.broadcast %41 : f32 to vector<16x16xf32>
    %235 = arith.mulf %234, %233 : vector<16x16xf32>
    %236 = arith.addf %232, %235 : vector<16x16xf32>
    %237 = vector.extract_strided_slice %228 {offsets = [0, 2], sizes = [16, 16], strides = [1, 1]} : vector<16x20xf32> to vector<16x16xf32>
    %238 = vector.broadcast %42 : f32 to vector<16x16xf32>
    %239 = arith.mulf %238, %237 : vector<16x16xf32>
    %240 = arith.addf %236, %239 : vector<16x16xf32>
    %241 = vector.extract_strided_slice %228 {offsets = [0, 3], sizes = [16, 16], strides = [1, 1]} : vector<16x20xf32> to vector<16x16xf32>
    %242 = vector.broadcast %43 : f32 to vector<16x16xf32>
    %243 = arith.mulf %242, %241 : vector<16x16xf32>
    %244 = arith.addf %240, %243 : vector<16x16xf32>
    %245 = vector.extract_strided_slice %228 {offsets = [0, 4], sizes = [16, 16], strides = [1, 1]} : vector<16x20xf32> to vector<16x16xf32>
    %246 = vector.broadcast %44 : f32 to vector<16x16xf32>
    %247 = arith.mulf %246, %245 : vector<16x16xf32>
    %248 = arith.addf %244, %247 : vector<16x16xf32>
    %c0_36 = arith.constant 0 : index
    %c1_37 = arith.constant 1 : index
    %c4_38 = arith.constant 4 : index
    %c0_39 = arith.constant 0 : index
    %249 = vector.load %arg2[%c0_36, %c1_37, %c4_38, %c0_39] : memref<1x2x20x20xf32, #tpu.memory_space<vmem>>, vector<1x1x16x20xf32>
    %250 = vector.shape_cast %249 : vector<1x1x16x20xf32> to vector<16x20xf32>
    %251 = vector.extract_strided_slice %250 {offsets = [0, 0], sizes = [16, 16], strides = [1, 1]} : vector<16x20xf32> to vector<16x16xf32>
    %252 = vector.broadcast %45 : f32 to vector<16x16xf32>
    %253 = arith.mulf %252, %251 : vector<16x16xf32>
    %254 = arith.addf %248, %253 : vector<16x16xf32>
    %255 = vector.extract_strided_slice %250 {offsets = [0, 1], sizes = [16, 16], strides = [1, 1]} : vector<16x20xf32> to vector<16x16xf32>
    %256 = vector.broadcast %46 : f32 to vector<16x16xf32>
    %257 = arith.mulf %256, %255 : vector<16x16xf32>
    %258 = arith.addf %254, %257 : vector<16x16xf32>
    %259 = vector.extract_strided_slice %250 {offsets = [0, 2], sizes = [16, 16], strides = [1, 1]} : vector<16x20xf32> to vector<16x16xf32>
    %260 = vector.broadcast %47 : f32 to vector<16x16xf32>
    %261 = arith.mulf %260, %259 : vector<16x16xf32>
    %262 = arith.addf %258, %261 : vector<16x16xf32>
    %263 = vector.extract_strided_slice %250 {offsets = [0, 3], sizes = [16, 16], strides = [1, 1]} : vector<16x20xf32> to vector<16x16xf32>
    %264 = vector.broadcast %48 : f32 to vector<16x16xf32>
    %265 = arith.mulf %264, %263 : vector<16x16xf32>
    %266 = arith.addf %262, %265 : vector<16x16xf32>
    %267 = vector.extract_strided_slice %250 {offsets = [0, 4], sizes = [16, 16], strides = [1, 1]} : vector<16x20xf32> to vector<16x16xf32>
    %268 = vector.broadcast %49 : f32 to vector<16x16xf32>
    %269 = arith.mulf %268, %267 : vector<16x16xf32>
    %270 = arith.addf %266, %269 : vector<16x16xf32>
    %271 = arith.negf %270 : vector<16x16xf32>
    %272 = math.exp %271 : vector<16x16xf32>
    %cst_40 = arith.constant 1.000000e+00 : f32
    %273 = vector.broadcast %cst_40 : f32 to vector<16x16xf32>
    %274 = arith.addf %273, %272 : vector<16x16xf32>
    %275 = arith.divf %273, %274 : vector<16x16xf32>
    %c0_41 = arith.constant 0 : index
    %c0_42 = arith.constant 0 : index
    %c0_43 = arith.constant 0 : index
    %276 = vector.load %arg3[%c0_41, %c0_42, %c0_43] : memref<1x16x16xf32, #tpu.memory_space<vmem>>, vector<1x16x16xf32>
    %277 = vector.shape_cast %276 : vector<1x16x16xf32> to vector<16x16xf32>
    %278 = vector.shape_cast %275 : vector<16x16xf32> to vector<1x16x16xf32>
    tpu.vector_store %arg3[%c0_41, %c0_42, %c0_43], %278 {strides = array<i32>} : memref<1x16x16xf32, #tpu.memory_space<vmem>>, vector<1x16x16xf32>,
    return
  }
  func.func @transform_0(%arg0: i32) -> i32 {
    %c0_i32 = arith.constant 0 : i32
    %c0_i32_0 = arith.constant 0 : i32
    return %c0_i32 : i32
  }
  func.func @transform_1(%arg0: i32) -> (i32, i32, i32, i32) {
    %c0_i32 = arith.constant 0 : i32
    %c0_i32_0 = arith.constant 0 : i32
    %c0_i32_1 = arith.constant 0 : i32
    %c0_i32_2 = arith.constant 0 : i32
    return %arg0, %c0_i32, %c0_i32_0, %c0_i32_1 : i32, i32, i32, i32
  }
  func.func @transform_2(%arg0: i32) -> (i32, i32, i32) {
    %c0_i32 = arith.constant 0 : i32
    %c0_i32_0 = arith.constant 0 : i32
    %c0_i32_1 = arith.constant 0 : i32
    return %arg0, %c0_i32, %c0_i32_0 : i32, i32, i32
  }
}

module attributes {stable_mosaic.version = 11 : i64} {
  func.func @_epilogue_kernel(%arg0: i32, %arg1: i32, %arg2: memref<1x1x256xf32, #tpu.memory_space<vmem>>, %arg3: memref<1x4x256xf32, #tpu.memory_space<vmem>>, %arg4: memref<1x4x256xf32, #tpu.memory_space<vmem>>, %arg5: memref<1x4x256xf32, #tpu.memory_space<vmem>>) attributes {dimension_semantics = [#tpu.dimension_semantics<parallel>, #tpu.dimension_semantics<parallel>], iteration_bounds = array<i64: 2, 1>, scalar_prefetch = 0 : i64, scratch_operands = 0 : i64, tpu.core_type = #tpu.core_type<tc>, window_params = [{transform_indices = @transform_0, window_bounds = array<i64: 1, 1, 256>}, {transform_indices = @transform_1, window_bounds = array<i64: 1, 4, 256>}, {transform_indices = @transform_2, window_bounds = array<i64: 1, 4, 256>}, {transform_indices = @transform_3, window_bounds = array<i64: 1, 4, 256>}]} {
    %c0 = arith.constant 0 : index
    %c0_0 = arith.constant 0 : index
    %c0_1 = arith.constant 0 : index
    %0 = vector.load %arg2[%c0, %c0_0, %c0_1] : memref<1x1x256xf32, #tpu.memory_space<vmem>>, vector<1x1x256xf32>
    %1 = vector.shape_cast %0 : vector<1x1x256xf32> to vector<1x256xf32>
    %c0_2 = arith.constant 0 : index
    %c0_3 = arith.constant 0 : index
    %c0_4 = arith.constant 0 : index
    %2 = vector.load %arg3[%c0_2, %c0_3, %c0_4] : memref<1x4x256xf32, #tpu.memory_space<vmem>>, vector<1x4x256xf32>
    %3 = vector.shape_cast %2 : vector<1x4x256xf32> to vector<4x256xf32>
    %4 = vector.broadcast %1 : vector<1x256xf32> to vector<4x256xf32>
    %5 = arith.mulf %4, %3 : vector<4x256xf32>
    %c0_5 = arith.constant 0 : index
    %c0_6 = arith.constant 0 : index
    %c0_7 = arith.constant 0 : index
    %6 = vector.load %arg4[%c0_5, %c0_6, %c0_7] : memref<1x4x256xf32, #tpu.memory_space<vmem>>, vector<1x4x256xf32>
    %7 = vector.shape_cast %6 : vector<1x4x256xf32> to vector<4x256xf32>
    %8 = arith.addf %5, %7 : vector<4x256xf32>
    %c0_8 = arith.constant 0 : index
    %c0_9 = arith.constant 0 : index
    %c0_10 = arith.constant 0 : index
    %9 = vector.load %arg5[%c0_8, %c0_9, %c0_10] : memref<1x4x256xf32, #tpu.memory_space<vmem>>, vector<1x4x256xf32>
    %10 = vector.shape_cast %9 : vector<1x4x256xf32> to vector<4x256xf32>
    %11 = vector.shape_cast %8 : vector<4x256xf32> to vector<1x4x256xf32>
    tpu.vector_store %arg5[%c0_8, %c0_9, %c0_10], %11 {strides = array<i32>} : memref<1x4x256xf32, #tpu.memory_space<vmem>>, vector<1x4x256xf32>,
    return
  }
  func.func @transform_0(%arg0: i32, %arg1: i32) -> (i32, i32, i32) {
    %c0_i32 = arith.constant 0 : i32
    %c0_i32_0 = arith.constant 0 : i32
    return %arg0, %c0_i32, %arg1 : i32, i32, i32
  }
  func.func @transform_1(%arg0: i32, %arg1: i32) -> (i32, i32, i32) {
    %c0_i32 = arith.constant 0 : i32
    %c0_i32_0 = arith.constant 0 : i32
    return %arg0, %c0_i32, %arg1 : i32, i32, i32
  }
  func.func @transform_2(%arg0: i32, %arg1: i32) -> (i32, i32, i32) {
    %c0_i32 = arith.constant 0 : i32
    %c0_i32_0 = arith.constant 0 : i32
    return %arg0, %c0_i32, %arg1 : i32, i32, i32
  }
  func.func @transform_3(%arg0: i32, %arg1: i32) -> (i32, i32, i32) {
    %c0_i32 = arith.constant 0 : i32
    %c0_i32_0 = arith.constant 0 : i32
    return %arg0, %c0_i32, %arg1 : i32, i32, i32
  }
}

</mosaic_0001>

<bundles_post_ra>
// kernel: rlm_forward.3
= control target key start
LH: loop header
LB: loop body
LE: loop exit
PB: predicated region body
PF: predicated region fallthrough
CT: control target
= control target key end

     0   :  { %s387_s6 = smov 0   ;;  %s389_s7 = smov 0   ;;  %s428_s0 = inlined_call_operand.vmem [shape: f32[2,4,256], index: 0, kind: input, shape index: {}]   ;;  %s429_s1 = inlined_call_operand.vmem [shape: f32[2,2,256], index: 1, kind: output, shape index: {}]  }
   0x1   :  { %s391_s8 = smov 0  }
   0x2 LB: > { %s23_s9 = sadd.s32 1, %s370_s7  ;;  %p315_p0 = scmp.ge.s32.totalorder %s374_s8, 1  ;;  %s374_s8 = sphi %s391_s8, %s11_s8   ;;  %s370_s7 = sphi %s389_s7, %s431_s7   ;;  %s366_s6 = sphi %s387_s6, %s430_s6  }
   0x3   : > { %p25_p1 = scmp.ge.s32.totalorder %s23_s9, 2  ;;  %p108_p2 = scmp.lt.s32.totalorder %s374_s8, 3 }
   0x5   : > { %s433_s9 = smov (%p25_p1, %s23_s9), 0  ;;  %p109_p3 = pnand %p315_p0, %p108_p2 }
   0x6   : > { %p137_p4 = scmp.lt.s32.totalorder (!%p109_p3), %s366_s6, 1 }
   0x7   : > { %112 = sbr.rel (%p109_p3) target bundleno = 49 (0x31), region = 24 }
   0xc   : > { %v376_v0 = vmov 4.0   ;;  %s435_s6 = smov (!%p137_p4, %s366_s6), 1  ;;  %vm163_vm0 = vcmask 1043456   ;;  %v193_v28 = vlaneseq  ;;  %vm190_vm2 = vcmask 1040384  }
   0xd   : > { %350 = vrcp.f32 %v376_v0  ;;  %s323_s10 = sshll.u32 %s435_s6, 3  ;;  %s324_s14 = sshll.u32 %s435_s6, 2 }
   0xe   : > { %s144_s13 = scalar_lea.vmem %s428_s0, %s323_s10  ;;  %vm195_vm3 = vcmp.lt.s32.totalorder %v193_v28, 256  ;;  %s154_s17 = scalar_lea.vmem %s429_s1, %s324_s14 }
   0xf   : > { %v156_v1 = vld [vmem:[%s144_s13] sm:$0xff] }
  0x10   : > { %158 = vst [vmem:[#allocation1] ss:$2 sm:$0xff] %v156_v1 }
  0x13   : > { %v351_v2 = vpop.eup %350 }
  0x14   : > { %v179_v3 = vmul.f32 4.0, %v351_v2  ;;  %vm183_vm1 = vweird.f32 %v351_v2 }
  0x16   : > { %v180_v4 = vsub.f32 1.0, %v179_v3 }
  0x17   : > { %v159_v5 = vld.sshfl [vmem:[#allocation1] sm:$0xff pattern:$0x75316420]  ;;  %v160_v6 = vld.sshfl [vmem:[#allocation1 + $0x8] sm:$0xff pattern:$0x75316420] }
  0x18   : > { %v164_v7 = vsel %vm163_vm0, %v159_v5, 0.0  ;;  %v171_v8 = vsel %vm163_vm0, %v160_v6, 0.0  ;;  %198 = vst [vmem:[#allocation1] ss:$2 sm:$0xff] %v156_v1  ;;  %v181_v11 = vmul.f32 %v351_v2, %v180_v4 }
  0x19   : > { %v165_v9 = vrot.slane %v164_v7, 4  ;;  %v172_v10 = vrot.slane %v171_v8, 4 }
  0x1a   : > { %v182_v16 = vadd.f32 %v351_v2, %v181_v11 }
  0x1b   : > { %v166_v12 = vadd.f32 %v165_v9, %v164_v7  ;;  %v173_v13 = vadd.f32 %v172_v10, %v171_v8 }
  0x1c   : > { %v184_v27 = vsel %vm183_vm1, %v351_v2, %v182_v16 }
  0x1d   : > { %v167_v14 = vrot.slane %v166_v12, 2  ;;  %v174_v15 = vrot.slane %v173_v13, 2 }
  0x1f   : > { %v168_v17 = vadd.f32 %v167_v14, %v166_v12  ;;  %v175_v18 = vadd.f32 %v174_v15, %v173_v13  ;;  %v199_v19 = vld.sshfl [vmem:[#allocation1] sm:$0xff pattern:$0x75316420]  ;;  %v200_v20 = vld.sshfl [vmem:[#allocation1 + $0x8] sm:$0xff pattern:$0x75316420] }
  0x20   : > { %v203_v21 = vsel %vm163_vm0, %v199_v19, -inf  ;;  %v210_v22 = vsel %vm163_vm0, %v200_v20, -inf }
  0x21   : > { %v169_v23 = vrot.slane %v168_v17, 1  ;;  %v176_v24 = vrot.slane %v175_v18, 1  ;;  %v204_v25 = vrot.slane %v203_v21, 4  ;;  %v211_v26 = vrot.slane %v210_v22, 4 }
  0x23   : > { %v170_v29 = vadd.f32 %v169_v23, %v168_v17  ;;  %v177_v30 = vadd.f32 %v176_v24, %v175_v18  ;;  %v205_v31 = vmax.f32 %v203_v21, %v204_v25  ;;  %v212_v32 = vmax.f32 %v210_v22, %v211_v26 }
  0x25   : > { %v186_v33 = vmul.f32 %v184_v27, %v177_v30  ;;  %v206_v34 = vrot.slane %v205_v31, 2  ;;  %v213_v35 = vrot.slane %v212_v32, 2  ;;  %v185_v36 = vmul.f32 %v184_v27, %v170_v29 }
  0x27   : > { %v189_v37 = vrot.slane %v186_v33, 7  ;;  %v207_v38 = vmax.f32 %v205_v31, %v206_v34  ;;  %v214_v39 = vmax.f32 %v212_v32, %v213_v35 }
  0x29   : > { %v191_v40 = vsel %vm190_vm2, %v185_v36, %v189_v37  ;;  %v208_v41 = vrot.slane %v207_v38, 1  ;;  %v215_v42 = vrot.slane %v214_v39, 1 }
  0x2a   : > { %197 = vst.msk [vmem:[%s154_s17] ss:$2 sm:$0x3] %vm195_vm3, %v191_v40 }
  0x2b   : > { %v216_v43 = vmax.f32 %v214_v39, %v215_v42  ;;  %v209_v44 = vmax.f32 %v207_v38, %v208_v41 }
  0x2d   : > { %v219_v45 = vrot.slane %v216_v43, 7 }
  0x2f   : > { %v220_v46 = vsel %vm190_vm2, %v209_v44, %v219_v45 }
  0x30   : > { %320 = vst.msk [vmem:[%s154_s17 + $0x1] ss:$2 sm:$0x3] %vm195_vm3, %v220_v46 }
  0x31 PF: > { %s11_s8 = sadd.s32 1, %s374_s8   ;;  %s430_s6 = smov %s370_s7 }
  0x32   : > { %p8_p5 = scmp.ge.s32.totalorder %s11_s8, 4   ;;  %s431_s7 = smov %s433_s9 }
  0x34   :  { %10 = sbr.rel (!%p8_p5) target bundleno = 2 (0x2), region = 55 }

// kernel: rlm_forward.5
= control target key start
LH: loop header
LB: loop body
LE: loop exit
PB: predicated region body
PF: predicated region fallthrough
CT: control target
= control target key end

     0   :  { %s515_s12 = smov 0   ;;  %s517_s13 = smov 0   ;;  %s554_s0 = inlined_call_operand.vmem [shape: f32[2,1,256], index: 0, kind: input, shape index: {}]   ;;  %s555_s1 = inlined_call_operand.vmem [shape: f32[2,4,256], index: 1, kind: input, shape index: {}]   ;;  %s556_s2 = inlined_call_operand.vmem [shape: f32[2,4,256], index: 2, kind: input, shape index: {}]   ;;  %s557_s3 = inlined_call_operand.vmem [shape: f32[2,4,256], index: 3, kind: output, shape index: {}]  }
   0x1   :  { %s519_s14 = smov 0  }
   0x2 LB: > { %s25_s15 = sadd.s32 1, %s489_s13  ;;  %p434_p0 = scmp.ge.s32.totalorder %s493_s14, 1  ;;  %s493_s14 = sphi %s519_s14, %s13_s14   ;;  %s489_s13 = sphi %s517_s13, %s559_s13   ;;  %s485_s12 = sphi %s515_s12, %s558_s12  }
   0x3   : > { %p27_p1 = scmp.ge.s32.totalorder %s25_s15, 2  ;;  %p191_p2 = scmp.lt.s32.totalorder %s493_s14, 3 }
   0x5   : > { %s561_s15 = smov (%p27_p1, %s25_s15), 0  ;;  %p192_p3 = pnand %p434_p0, %p191_p2 }
   0x6   : > { %p241_p4 = scmp.lt.s32.totalorder (!%p192_p3), %s485_s12, 1 }
   0x7   : > { %195 = sbr.rel (%p192_p3) target bundleno = 38 (0x26), region = 32 }
   0xc   : > { %s563_s12 = smov (!%p241_p4, %s485_s12), 1  ;;  %vm306_vm0 = vcmask 1043456  }
   0xd   : > { %s444_s16 = sshll.u32 %s563_s12, 3  ;;  %s435_s20 = sshll.u32 %s563_s12, 1 }
   0xe   : > { %s257_s19 = scalar_lea.vmem %s555_s1, %s444_s16  ;;  %s267_s23 = scalar_lea.vmem %s556_s2, %s444_s16 }
   0xf   : > { %v280_v0 = vld [vmem:[%s257_s19] sm:$0xff]  ;;  %s247_s26 = scalar_lea.vmem %s554_s0, %s435_s20  ;;  %s277_s29 = scalar_lea.vmem %s557_s3, %s444_s16 }
  0x10   : > { %287 = vst [vmem:[#allocation1] ss:$2 sm:$0xff] %v280_v0  ;;  %v294_v1 = vld [vmem:[%s267_s23] sm:$0xff] }
  0x11   : > { %v279_v2 = vld [vmem:[%s247_s26] sm:$0x3] }
  0x12   : > { %v283_v5 = vperm.slane %v279_v2, 1  ;;  %v282_v6 = vperm.slane %v279_v2, 0 }
  0x17   : > { %v288_v3 = vld.sshfl [vmem:[#allocation1] sm:$0xff pattern:$0x75316420]  ;;  %v289_v4 = vld.sshfl [vmem:[#allocation1 + $0x8] sm:$0xff pattern:$0x75316420] }
  0x18   : > { %296 = vst [vmem:[#allocation1] ss:$2 sm:$0xff] %v294_v1  ;;  %v293_v7 = vmul.f32 %v289_v4, %v283_v5  ;;  %v292_v10 = vmul.f32 %v288_v3, %v282_v6 }
  0x1f   : > { %v297_v8 = vld.sshfl [vmem:[#allocation1] sm:$0xff pattern:$0x75316420]  ;;  %v298_v9 = vld.sshfl [vmem:[#allocation1 + $0x8] sm:$0xff pattern:$0x75316420] }
  0x20   : > { %v302_v11 = vadd.f32 %v298_v9, %v293_v7  ;;  %v301_v12 = vadd.f32 %v297_v8, %v292_v10 }
  0x22   : > { %v305_v13 = vrot.slane %v302_v11, 4 }
  0x24   : > { %v307_v14 = vsel %vm306_vm0, %v301_v12, %v305_v13 }
  0x25   : > { %309 = vst [vmem:[%s277_s29] sm:$0xff] %v307_v14 }
  0x26 PF: > { %s13_s14 = sadd.s32 1, %s493_s14   ;;  %s558_s12 = smov %s489_s13 }
  0x27   : > { %p10_p5 = scmp.ge.s32.totalorder %s13_s14, 4   ;;  %s559_s13 = smov %s561_s15 }
  0x29   :  { %12 = sbr.rel (!%p10_p5) target bundleno = 2 (0x2), region = 68 }

// kernel: rlm_forward.4
= control target key start
LH: loop header
LB: loop body
LE: loop exit
PB: predicated region body
PF: predicated region fallthrough
CT: control target
= control target key end

     0   :  { %7 = vsyncpa [#allocation3], 0  ;;  %s1060_s9 = smov 0   ;;  %s1359_s0 = inlined_call_operand.vmem [shape: f32[50], index: 0, kind: input, shape index: {}]   ;;  %s1360_s1 = inlined_call_operand.vmem [shape: f32[2,2,20,20], index: 1, kind: input, shape index: {}]   ;;  %s1361_s2 = inlined_call_operand.vmem [shape: f32[2,16,16], index: 2, kind: output, shape index: {}]  }
   0x1 LB: > { %s907_s10 = sadd.s32 4294967295, %s1038_s9   ;;  %p909_p0 = scmp.ge.s32.totalorder %s1038_s9, 1  ;;  %s1038_s9 = sphi %s1060_s9, %s13_s9  }
   0x2   : > { %p91_p1 = scmp.lt.s32.totalorder %s1038_s9, 3  ;;  %s103_s13 = sshll.u32 %s1359_s0, 4  ;;  %s104_s13 = int_to_ptr.vmem [resolvable:$true] %s103_s13 }
   0x3   : > { %p990_p3 = scmp.eq.s32.totalorder %s907_s10, 0  ;;  %s1040_s14 = smov [#allocation2]  }
   0x4   : > { %p92_p2 = pnand %p909_p0, %p91_p1 }
   0x6   : > { %p986_p4 = pneg %p92_p2  ;;  %124 = sbr.rel (%p92_p2) target bundleno = 378 (0x17a), region = 28 }
   0x8   : > { %p987_p5 = pnand %p990_p3, %p986_p4 }
   0xa   : > { %989 = dma.vmem_to_smem (!%p987_p5), %s104_s13, 16, %s1040_s14, [#allocation3]  }
   0xb   : > { %1033 = dma.done.wait (%p990_p3), [#allocation3], 16  }
   0xc   : > { %1035 = vsyncadd (%p990_p3), [#allocation3], 4294967280 }
   0xd   : > { %131 = sfence }
   0xe   : > { %p148_p6 = scmp.lt.s32.totalorder %s907_s10, 1  ;;  %s918_s15 = sld [smem:[#allocation2 + $0x2]]  ;;  %vm837_vm3 = vcmask 130048  }
   0xf   : > { %s917_s16 = sld [smem:[#allocation2 + $0x1]]  ;;  %s1041_s22 = smov 126  }
  0x10   : > { %s1363_s10 = smov (!%p148_p6, %s907_s10), 1  ;;  %s919_s21 = sld [smem:[#allocation2 + $0x3]] }
  0x11   : > { %s981_s17 = smul.u32 48, %s1363_s10  ;;  %s1042_s23 = smov 127  }
  0x12   : > { %s920_s24 = sld [smem:[#allocation2 + $0x4]]  ;;  %s1043_s25 = smov 125  }
  0x13   : > { %s1077_s20 = scalar_lea.vmem %s1360_s1, %s981_s17  ;;  %s923_s26 = sld [smem:[#allocation2 + $0x7]] }
  0x14   : > { %v228_v0 = vstv %s918_s15  ;;  %v1080_v1 = vld [vmem:[%s1077_s20] sm:$0xff]  ;;  %v1087_v5 = vld [vmem:[%s1077_s20 + $0x8] sm:$0xff]  ;;  %s922_s27 = sld [smem:[#allocation2 + $0x6]]  ;;  %s1044_s28 = smov 124  }
  0x15   : > { %v215_v2 = vstv %s917_s16  ;;  %v229_v3 = vmul.f32 %v228_v0, %v1080_v1  ;;  %v230_v7 = vmul.f32 %v228_v0, %v1087_v5  ;;  %v1102_v14 = vld [vmem:[%s1077_s20 + $0x1] sm:$0xff]  ;;  %v1105_v16 = vld [vmem:[%s1077_s20 + $0x9] sm:$0xff]  ;;  %s924_s29 = sld [smem:[#allocation2 + $0x8]] }
  0x16   : > { %v216_v4 = vmul.f32 %v215_v2, %v1080_v1  ;;  %v241_v6 = vstv %s919_s21  ;;  %v217_v8 = vmul.f32 %v215_v2, %v1087_v5  ;;  %s927_s30 = sld [smem:[#allocation2 + $0xb]]  ;;  %v1120_v25 = vld [vmem:[%s1077_s20 + $0x2] sm:$0xff]  ;;  %v1129_v31 = vld [vmem:[%s1077_s20 + $0xa] sm:$0xff] }
  0x17   : > { %233 = vrot.lane.b32.xlu1 %v229_v3, %s1041_s22  ;;  %v242_v9 = vmul.f32 %v241_v6, %v1080_v1  ;;  %v243_v11 = vmul.f32 %v241_v6, %v1087_v5  ;;  %s925_s3 = sld [smem:[#allocation2 + $0x9]]  ;;  %v1144_v41 = vld [vmem:[%s1077_s20 + $0xb] sm:$0xff]  ;;  %v1147_v43 = vld [vmem:[%s1077_s20 + $0x3] sm:$0xff]  ;;  %v1186_v6 = vld [vmem:[%s1077_s20 + $0x18] sm:$0xff] }
  0x18   : > { %220 = vrot.lane.b32.xlu0 %v216_v4, %s1042_s23  ;;  %v254_v10 = vstv %s920_s24  ;;  %s928_s4 = sld [smem:[#allocation2 + $0xc]]  ;;  %v1168_v56 = vld [vmem:[%s1077_s20 + $0x4] sm:$0xff]  ;;  %v1171_v58 = vld [vmem:[%s1077_s20 + $0xc] sm:$0xff] }
  0x19   : > { %246 = vrot.lane.b32.xlu2 %v242_v9, %s1043_s25  ;;  %v256_v12 = vmul.f32 %v254_v10, %v1087_v5  ;;  %v255_v13 = vmul.f32 %v254_v10, %v1080_v1  ;;  %v287_v15 = vstv %s923_s26  ;;  %s930_s5 = sld [smem:[#allocation2 + $0xe]] }
  0x1a   : > { %v274_v17 = vstv %s922_s27  ;;  %v288_v19 = vmul.f32 %v287_v15, %v1102_v14  ;;  %v289_v22 = vmul.f32 %v287_v15, %v1105_v16  ;;  %s929_s6 = sld [smem:[#allocation2 + $0xd]] }
  0x1b   : > { %v275_v18 = vmul.f32 %v274_v17, %v1102_v14  ;;  %v276_v20 = vmul.f32 %v274_v17, %v1105_v16  ;;  %v300_v21 = vstv %s924_s29  ;;  %s932_s7 = sld [smem:[#allocation2 + $0x10]] }
  0x1c   : > { %v302_v23 = vmul.f32 %v300_v21, %v1105_v16  ;;  %v301_v24 = vmul.f32 %v300_v21, %v1102_v14  ;;  %v333_v26 = vstv %s927_s30  ;;  %s934_s8 = sld [smem:[#allocation2 + $0x12]] }
  0x1d   : > { %v313_v27 = vstv %s925_s3  ;;  %v334_v29 = vmul.f32 %v333_v26, %v1120_v25  ;;  %v335_v33 = vmul.f32 %v333_v26, %v1129_v31  ;;  %s933_s11 = sld [smem:[#allocation2 + $0x11]] }
  0x1e   : > { %v314_v28 = vmul.f32 %v313_v27, %v1102_v14  ;;  %v315_v30 = vmul.f32 %v313_v27, %v1105_v16  ;;  %v346_v32 = vstv %s928_s4  ;;  %s935_s12 = sld [smem:[#allocation2 + $0x13]] }
  0x1f   : > { %235 = vrot.lane.b32.xlu1 %v230_v7, %s1041_s22  ;;  %v348_v34 = vmul.f32 %v346_v32, %v1129_v31  ;;  %v347_v35 = vmul.f32 %v346_v32, %v1120_v25  ;;  %v372_v36 = vstv %s930_s5  ;;  %s938_s13 = sld [smem:[#allocation2 + $0x16]] }
  0x20   : > { %222 = vrot.lane.b32.xlu0 %v217_v8, %s1042_s23  ;;  %v359_v37 = vstv %s929_s6  ;;  %v373_v39 = vmul.f32 %v372_v36, %v1120_v25  ;;  %v374_v44 = vmul.f32 %v372_v36, %v1129_v31  ;;  %s937_s14 = sld [smem:[#allocation2 + $0x15]]  ;;  %v1222_v36 = vld [vmem:[%s1077_s20 + $0x21] sm:$0xff] }
  0x21   : > { %248 = vrot.lane.b32.xlu2 %v243_v11, %s1043_s25  ;;  %v360_v38 = vmul.f32 %v359_v37, %v1120_v25  ;;  %v361_v40 = vmul.f32 %v359_v37, %v1129_v31  ;;  %v392_v42 = vstv %s932_s7  ;;  %s939_s15 = sld [smem:[#allocation2 + $0x17]] }
  0x22   : > { %v394_v45 = vmul.f32 %v392_v42, %v1144_v41  ;;  %v393_v46 = vmul.f32 %v392_v42, %v1147_v43  ;;  %v418_v47 = vstv %s934_s8  ;;  %s942_s16 = sld [smem:[#allocation2 + $0x1a]] }
  0x23   : > { %v405_v48 = vstv %s933_s11  ;;  %v419_v50 = vmul.f32 %v418_v47, %v1147_v43  ;;  %v420_v53 = vmul.f32 %v418_v47, %v1144_v41  ;;  %s940_s17 = sld [smem:[#allocation2 + $0x18]] }
  0x24   : > { %v406_v49 = vmul.f32 %v405_v48, %v1147_v43  ;;  %v407_v51 = vmul.f32 %v405_v48, %v1144_v41  ;;  %v431_v52 = vstv %s935_s12  ;;  %s943_s18 = sld [smem:[#allocation2 + $0x1b]] }
  0x25   : > { %v433_v54 = vmul.f32 %v431_v52, %v1144_v41  ;;  %v432_v55 = vmul.f32 %v431_v52, %v1147_v43  ;;  %v464_v57 = vstv %s938_s13  ;;  %s1191_s19 = sld [smem:[#allocation2]] }
  0x26   : > { %v451_v59 = vstv %s937_s14  ;;  %v465_v61 = vmul.f32 %v464_v57, %v1168_v56  ;;  %v466_v0 = vmul.f32 %v464_v57, %v1171_v58  ;;  %s1196_s21 = sld [smem:[#allocation2 + $0x1d]] }
  0x27   : > { %261 = vrot.lane.b32.xlu1 %v256_v12, %s1044_s28  ;;  %v452_v60 = vmul.f32 %v451_v59, %v1168_v56  ;;  %v453_v62 = vmul.f32 %v451_v59, %v1171_v58  ;;  %v477_v63 = vstv %s939_s15  ;;  %s944_s24 = sld [smem:[#allocation2 + $0x1c]] }
  0x28   : > { %259 = vrot.lane.b32.xlu0 %v255_v13, %s1044_s28  ;;  %v479_v2 = vmul.f32 %v477_v63, %v1171_v58  ;;  %v478_v3 = vmul.f32 %v477_v63, %v1168_v56  ;;  %v511_v7 = vstv %s942_s16  ;;  %v1199_v13 = vld [vmem:[%s1077_s20 + $0x20] sm:$0xff]  ;;  %s947_s26 = sld [smem:[#allocation2 + $0x1f]] }
  0x29   : > { %279 = vrot.lane.b32.xlu2 %v275_v18, %s1042_s23  ;;  %v490_v8 = vstv %s940_s17  ;;  %v512_v10 = vmul.f32 %v1186_v6, %v511_v7  ;;  %v513_v17 = vmul.f32 %v1199_v13, %v511_v7  ;;  %s1213_s27 = sld [smem:[#allocation2 + $0x5]] }
  0x2a   : > { %v491_v9 = vmul.f32 %v490_v8, %v1168_v56  ;;  %v492_v11 = vmul.f32 %v490_v8, %v1171_v58  ;;  %v524_v15 = vstv %s943_s18  ;;  %s1219_s29 = sld [smem:[#allocation2 + $0x21]] }
  0x2b   : > { %v526_v18 = vmul.f32 %v1199_v13, %v524_v15  ;;  %s948_s30 = sld [smem:[#allocation2 + $0x20]] }
  0x2c   : > { %s950_s3 = sld [smem:[#allocation2 + $0x22]] }
  0x2d   : > { %s1243_s4 = sld [smem:[#allocation2 + $0x25]] }
  0x2e   : > { %v570_v37 = vstv %s947_s26  ;;  %s952_s5 = sld [smem:[#allocation2 + $0x24]] }
  0x2f   : > { %292 = vrot.lane.b32.xlu1 %v288_v19, %s1041_s22  ;;  %v525_v19 = vmul.f32 %v1186_v6, %v524_v15  ;;  %v269_v47 = vstv %s1213_s27  ;;  %s1245_s6 = sld [smem:[#allocation2 + $0xa]] }
  0x30   : > { %281 = vrot.lane.b32.xlu0 %v276_v20, %s1042_s23  ;;  %v210_v20 = vstv %s1191_s19  ;;  %s954_s7 = sld [smem:[#allocation2 + $0x26]] }
  0x31   : > { %294 = vrot.lane.b32.xlu2 %v289_v22, %s1041_s22  ;;  %v211_v21 = vmul.f32 %v210_v20, %v1080_v1  ;;  %v583_v52 = vstv %s948_s30  ;;  %s1268_s8 = sld [smem:[#allocation2 + $0x29]] }
  0x32   : > { %s955_s11 = sld [smem:[#allocation2 + $0x27]] }
  0x33   : > { %s958_s12 = sld [smem:[#allocation2 + $0x2a]] }
  0x34   : > { %s931_s13 = sld [smem:[#allocation2 + $0xf]] }
  0x35   : > { %s1287_s14 = sld [smem:[#allocation2 + $0x2c]] }
  0x36   : > { %s959_s15 = sld [smem:[#allocation2 + $0x2b]] }
  0x37   : > { %307 = vrot.lane.b32.xlu1 %v302_v23, %s1043_s25  ;;  %v550_v23 = vstv %s1196_s21  ;;  %s962_s16 = sld [smem:[#allocation2 + $0x2e]] }
  0x38   : > { %305 = vrot.lane.b32.xlu0 %v301_v24, %s1043_s25  ;;  %v537_v24 = vstv %s944_s24  ;;  %v552_v42 = vmul.f32 %v1199_v13, %v550_v23  ;;  %s1304_s17 = sld [smem:[#allocation2 + $0x14]]  ;;  %s980_s24 = sshll.u32 %s1363_s10, 4 }
  0x39   : > { %318 = vrot.lane.b32.xlu2 %v314_v28, %s1044_s28  ;;  %v538_v28 = vmul.f32 %v1186_v6, %v537_v24  ;;  %v539_v32 = vmul.f32 %v1199_v13, %v537_v24  ;;  %s1309_s18 = sld [smem:[#allocation2 + $0x30]] }
  0x3a   : > { %s963_s19 = sld [smem:[#allocation2 + $0x2f]] }
  0x3b   : > { %s961_s21 = sld [smem:[#allocation2 + $0x2d]] }
  0x3f   : > { %338 = vrot.lane.b32.xlu1 %v334_v29, %s1042_s23 }
  0x40   : > { %320 = vrot.lane.b32.xlu0 %v315_v30, %s1044_s28  ;;  %v551_v30 = vmul.f32 %v1186_v6, %v550_v23  ;;  %v328_v23 = vstv %s1245_s6 }
  0x41   : > { %340 = vrot.lane.b32.xlu2 %v335_v33, %s1042_s23 }
  0x47   : > { %353 = vrot.lane.b32.xlu1 %v348_v34, %s1041_s22  ;;  %v212_v34 = vmul.f32 %v210_v20, %v1087_v5  ;;  %v629_v20 = vstv %s952_s5 }
  0x48   : > { %351 = vrot.lane.b32.xlu0 %v347_v35, %s1041_s22 }
  0x49   : > { %364 = vrot.lane.b32.xlu2 %v360_v38, %s1043_s25  ;;  %v1225_v38 = vld [vmem:[%s1077_s20 + $0x19] sm:$0xff] }
  0x4f   : > { %377 = vrot.lane.b32.xlu1 %v373_v39, %s1044_s28 }
  0x50   : > { %366 = vrot.lane.b32.xlu0 %v361_v40, %s1043_s25 }
  0x51   : > { %379 = vrot.lane.b32.xlu2 %v374_v44, %s1044_s28  ;;  %v572_v44 = vmul.f32 %v1222_v36, %v570_v37 }
  0x57   : > { %399 = vrot.lane.b32.xlu1 %v394_v45, %s1042_s23  ;;  %v571_v45 = vmul.f32 %v1225_v38, %v570_v37 }
  0x58   : > { %397 = vrot.lane.b32.xlu0 %v393_v46, %s1042_s23 }
  0x59   : > { %410 = vrot.lane.b32.xlu2 %v406_v49, %s1041_s22 }
  0x5f   : > { %423 = vrot.lane.b32.xlu1 %v419_v50, %s1043_s25  ;;  %v270_v50 = vmul.f32 %v269_v47, %v1102_v14 }
  0x60   : > { %412 = vrot.lane.b32.xlu0 %v407_v51, %s1041_s22  ;;  %v596_v51 = vstv %s1219_s29  ;;  %s157_s29 = scalar_lea.vmem %s1361_s2, %s980_s24 }
  0x61   : > { %425 = vrot.lane.b32.xlu2 %v420_v53, %s1043_s25 }
  0x67   : > { %438 = vrot.lane.b32.xlu1 %v433_v54, %s1044_s28 }
  0x68   : > { %436 = vrot.lane.b32.xlu0 %v432_v55, %s1044_s28  ;;  %v584_v55 = vmul.f32 %v1225_v38, %v583_v52 }
  0x69   : > { %456 = vrot.lane.b32.xlu2 %v452_v60, %s1042_s23  ;;  %v597_v60 = vmul.f32 %v1225_v38, %v596_v51 }
  0x6f   : > { %469 = vrot.lane.b32.xlu1 %v465_v61, %s1041_s22  ;;  %v585_v61 = vmul.f32 %v1222_v36, %v583_v52 }
  0x70   : > { %458 = vrot.lane.b32.xlu0 %v453_v62, %s1042_s23  ;;  %v271_v62 = vmul.f32 %v269_v47, %v1105_v16  ;;  %v598_v16 = vmul.f32 %v1222_v36, %v596_v51  ;;  %v1278_v47 = vld [vmem:[%s1077_s20 + $0x1b] sm:$0xff] }
  0x71   : > { %471 = vrot.lane.b32.xlu2 %v466_v0, %s1041_s22 }
  0x73   : > { %v247_v4 = vpop.permute.xlu2 %246 }
  0x77   : > { %484 = vrot.lane.b32.xlu1 %v479_v2, %s1043_s25 }
  0x78   : > { %482 = vrot.lane.b32.xlu0 %v478_v3, %s1043_s25  ;;  %v609_v3 = vstv %s950_s3 }
  0x79   : > { %495 = vrot.lane.b32.xlu2 %v491_v9, %s1044_s28 }
  0x7b   : > { %v249_v12 = vpop.permute.xlu2 %248 }
  0x7f   : > { %516 = vrot.lane.b32.xlu1 %v512_v10, %s1042_s23  ;;  %v611_v10 = vmul.f32 %v1222_v36, %v609_v3 }
  0x80   : > { %497 = vrot.lane.b32.xlu0 %v492_v11, %s1044_s28  ;;  %v610_v11 = vmul.f32 %v1225_v38, %v609_v3 }
  0x81   : > { %518 = vrot.lane.b32.xlu2 %v513_v17, %s1042_s23  ;;  %v1254_v17 = vld [vmem:[%s1077_s20 + $0x1a] sm:$0xff] }
  0x82   : > { %v630_v24 = vmul.f32 %v1254_v17, %v629_v20 }
  0x83   : > { %v280_v22 = vpop.permute.xlu2 %279 }
  0x87   : > { %531 = vrot.lane.b32.xlu1 %v526_v18, %s1041_s22  ;;  %v642_v18 = vstv %s1243_s4 }
  0x88   : > { %529 = vrot.lane.b32.xlu0 %v525_v19, %s1041_s22  ;;  %v1258_v19 = vld [vmem:[%s1077_s20 + $0x22] sm:$0xff] }
  0x89   : > { %v234_v26 = vpop.permute.xlu1 %233  ;;  %542 = vrot.lane.b32.xlu2 %v538_v28, %s1043_s25  ;;  %v643_v28 = vmul.f32 %v1254_v17, %v642_v18 }
  0x8a   : > { %v221_v27 = vpop.permute.xlu0 %220 }
  0x8b   : > { %v226_v29 = vadd.f32 %v221_v27, %v211_v21  ;;  %v295_v35 = vpop.permute.xlu2 %294 }
  0x8d   : > { %v239_v1 = vadd.f32 %v234_v26, %v226_v29  ;;  %v631_v29 = vmul.f32 %v1258_v19, %v629_v20  ;;  %v714_v20 = vstv %s959_s15 }
  0x8f   : > { %v252_v33 = vadd.f32 %v247_v4, %v239_v1  ;;  %555 = vrot.lane.b32.xlu1 %v551_v30, %s1044_s28  ;;  %v329_v30 = vmul.f32 %v328_v23, %v1120_v25  ;;  %v644_v25 = vmul.f32 %v1258_v19, %v642_v18  ;;  %v727_v18 = vstv %s1287_s14 }
  0x90   : > { %544 = vrot.lane.b32.xlu0 %v539_v32, %s1043_s25 }
  0x91   : > { %v236_v39 = vpop.permute.xlu1 %235  ;;  %557 = vrot.lane.b32.xlu2 %v552_v42, %s1044_s28 }
  0x92   : > { %v223_v40 = vpop.permute.xlu0 %222 }
  0x93   : > { %v227_v5 = vadd.f32 %v223_v40, %v212_v34  ;;  %v319_v49 = vpop.permute.xlu2 %318  ;;  %v330_v34 = vmul.f32 %v328_v23, %v1129_v31 }
  0x95   : > { %v240_v46 = vadd.f32 %v236_v39, %v227_v5 }
  0x97   : > { %v253_v48 = vadd.f32 %v249_v12, %v240_v46  ;;  %577 = vrot.lane.b32.xlu1 %v572_v44, %s1042_s23 }
  0x98   : > { %575 = vrot.lane.b32.xlu0 %v571_v45, %s1042_s23 }
  0x99   : > { %v262_v53 = vpop.permute.xlu1 %261  ;;  %588 = vrot.lane.b32.xlu2 %v584_v55, %s1041_s22 }
  0x9a   : > { %v260_v54 = vpop.permute.xlu0 %259  ;;  %v266_v57 = vadd.f32 %v262_v53, %v253_v48  ;;  %v688_v48 = vstv %s1268_s8 }
  0x9b   : > { %v265_v59 = vadd.f32 %v260_v54, %v252_v33  ;;  %v341_v14 = vpop.permute.xlu2 %340  ;;  %v689_v55 = vmul.f32 %v1278_v47, %v688_v48 }
  0x9c   : > { %v273_v2 = vadd.f32 %v271_v62, %v266_v57  ;;  %v701_v62 = vstv %s958_s12 }
  0x9d   : > { %v272_v63 = vadd.f32 %v270_v50, %v265_v59 }
  0x9f   : > { %v285_v0 = vadd.f32 %v280_v22, %v272_v63  ;;  %601 = vrot.lane.b32.xlu1 %v597_v60, %s1043_s25 }
  0xa0   : > { %590 = vrot.lane.b32.xlu0 %v585_v61, %s1041_s22  ;;  %v1290_v61 = vld [vmem:[%s1077_s20 + $0x23] sm:$0xff] }
  0xa1   : > { %v293_v4 = vpop.permute.xlu1 %292  ;;  %603 = vrot.lane.b32.xlu2 %v598_v16, %s1043_s25  ;;  %v702_v16 = vmul.f32 %v1278_v47, %v701_v62 }
  0xa2   : > { %v282_v7 = vpop.permute.xlu0 %281  ;;  %v298_v8 = vadd.f32 %v293_v4, %v285_v0 }
  0xa3   : > { %v286_v9 = vadd.f32 %v282_v7, %v273_v2  ;;  %v365_v15 = vpop.permute.xlu2 %364  ;;  %v690_v2 = vmul.f32 %v1290_v61, %v688_v48  ;;  %v703_v7 = vmul.f32 %v1290_v61, %v701_v62 }
  0xa5   : > { %v299_v12 = vadd.f32 %v295_v35, %v286_v9  ;;  %v655_v35 = vstv %s954_s7 }
  0xa6   : > { %v657_v5 = vmul.f32 %v1258_v19, %v655_v35  ;;  %v656_v44 = vmul.f32 %v1254_v17, %v655_v35 }
  0xa7   : > { %616 = vrot.lane.b32.xlu1 %v611_v10, %s1044_s28 }
  0xa8   : > { %614 = vrot.lane.b32.xlu0 %v610_v11, %s1044_s28 }
  0xa9   : > { %v308_v21 = vpop.permute.xlu1 %307  ;;  %634 = vrot.lane.b32.xlu2 %v630_v24, %s1042_s23  ;;  %v728_v24 = vmul.f32 %v1278_v47, %v727_v18 }
  0xaa   : > { %v306_v22 = vpop.permute.xlu0 %305  ;;  %v312_v26 = vadd.f32 %v308_v21, %v299_v12 }
  0xab   : > { %v311_v27 = vadd.f32 %v306_v22, %v298_v8  ;;  %v380_v1 = vpop.permute.xlu2 %379 }
  0xad   : > { %v324_v32 = vadd.f32 %v319_v49, %v311_v27  ;;  %v668_v49 = vstv %s955_s11 }
  0xae   : > { %v669_v52 = vmul.f32 %v1254_v17, %v668_v49  ;;  %v670_v57 = vmul.f32 %v1258_v19, %v668_v49 }
  0xaf   : > { %647 = vrot.lane.b32.xlu1 %v643_v28, %s1041_s22  ;;  %v331_v33 = vadd.f32 %v329_v30, %v324_v32  ;;  %v747_v30 = vstv %s962_s16  ;;  %v1317_v32 = vld [vmem:[%s1077_s20 + $0x1c] sm:$0xff] }
  0xb0   : > { %636 = vrot.lane.b32.xlu0 %v631_v29, %s1042_s23  ;;  %v1314_v29 = vld [vmem:[%s1077_s20 + $0x24] sm:$0xff]  ;;  %s965_s20 = sld [smem:[#allocation2 + $0x31]] }
  0xb1   : > { %v339_v37 = vpop.permute.xlu1 %338  ;;  %649 = vrot.lane.b32.xlu2 %v644_v25, %s1041_s22  ;;  %v748_v25 = vmul.f32 %v1317_v32, %v747_v30 }
  0xb2   : > { %v321_v39 = vpop.permute.xlu0 %320  ;;  %v344_v40 = vadd.f32 %v339_v37, %v331_v33 }
  0xb3   : > { %v325_v42 = vadd.f32 %v321_v39, %v312_v26  ;;  %v411_v31 = vpop.permute.xlu2 %410  ;;  %v716_v26 = vmul.f32 %v1290_v61, %v714_v20  ;;  %v749_v39 = vmul.f32 %v1314_v29, %v747_v30 }
  0xb5   : > { %v332_v45 = vadd.f32 %v330_v34, %v325_v42  ;;  %v729_v34 = vmul.f32 %v1290_v61, %v727_v18  ;;  %v446_v42 = vstv %s1304_s17 }
  0xb6   : > { %v448_v18 = vmul.f32 %v446_v42, %v1171_v58 }
  0xb7   : > { %v345_v46 = vadd.f32 %v341_v14, %v332_v45  ;;  %662 = vrot.lane.b32.xlu1 %v657_v5, %s1043_s25  ;;  %v387_v14 = vstv %s931_s13  ;;  %v773_v45 = vstv %s1309_s18 }
  0xb8   : > { %660 = vrot.lane.b32.xlu0 %v656_v44, %s1043_s25  ;;  %v389_v9 = vmul.f32 %v387_v14, %v1144_v41  ;;  %v388_v10 = vmul.f32 %v387_v14, %v1147_v43  ;;  %v715_v41 = vmul.f32 %v1278_v47, %v714_v20  ;;  %v447_v44 = vmul.f32 %v446_v42, %v1168_v56 }
  0xb9   : > { %v354_v50 = vpop.permute.xlu1 %353  ;;  %673 = vrot.lane.b32.xlu2 %v669_v52, %s1044_s28  ;;  %v774_v52 = vmul.f32 %v1317_v32, %v773_v45  ;;  %v775_v62 = vmul.f32 %v1314_v29, %v773_v45 }
  0xba   : > { %v352_v51 = vpop.permute.xlu0 %351  ;;  %v358_v53 = vadd.f32 %v354_v50, %v345_v46  ;;  %v760_v46 = vstv %s963_s19 }
  0xbb   : > { %v357_v54 = vadd.f32 %v352_v51, %v344_v40  ;;  %v426_v60 = vpop.permute.xlu2 %425  ;;  %v761_v49 = vmul.f32 %v1317_v32, %v760_v46 }
  0xbd   : > { %v370_v59 = vadd.f32 %v365_v15, %v357_v54 }
  0xbf   : > { %693 = vrot.lane.b32.xlu1 %v689_v55, %s1042_s23 }
  0xc0   : > { %675 = vrot.lane.b32.xlu0 %v670_v57, %s1044_s28  ;;  %v786_v57 = vstv %s965_s20 }
  0xc1   : > { %v378_v63 = vpop.permute.xlu1 %377  ;;  %695 = vrot.lane.b32.xlu2 %v690_v2, %s1042_s23  ;;  %v787_v14 = vmul.f32 %v1317_v32, %v786_v57 }
  0xc2   : > { %v367_v0 = vpop.permute.xlu0 %366  ;;  %v383_v3 = vadd.f32 %v378_v63, %v370_v59 }
  0xc3   : > { %v371_v4 = vadd.f32 %v367_v0, %v358_v53  ;;  %v457_v11 = vpop.permute.xlu2 %456  ;;  %v762_v53 = vmul.f32 %v1314_v29, %v760_v46  ;;  %v788_v0 = vmul.f32 %v1314_v29, %v786_v57 }
  0xc4   : > { %v390_v15 = vadd.f32 %v388_v10, %v383_v3 }
  0xc5   : > { %v384_v8 = vadd.f32 %v380_v1, %v371_v4 }
  0xc7   : > { %708 = vrot.lane.b32.xlu1 %v703_v7, %s1041_s22  ;;  %v391_v12 = vadd.f32 %v389_v9, %v384_v8 }
  0xc8   : > { %706 = vrot.lane.b32.xlu0 %v702_v16, %s1041_s22 }
  0xc9   : > { %v400_v21 = vpop.permute.xlu1 %399  ;;  %719 = vrot.lane.b32.xlu2 %v715_v41, %s1043_s25 }
  0xca   : > { %v398_v22 = vpop.permute.xlu0 %397  ;;  %v404_v23 = vadd.f32 %v400_v21, %v391_v12 }
  0xcb   : > { %v403_v43 = vadd.f32 %v398_v22, %v390_v15  ;;  %v1311_v28 = vpop.permute.xlu2 %471 }
  0xcd   : > { %v416_v27 = vadd.f32 %v411_v31, %v403_v43 }
  0xcf   : > { %732 = vrot.lane.b32.xlu1 %v728_v24, %s1044_s28 }
  0xd0   : > { %721 = vrot.lane.b32.xlu0 %v716_v26, %s1043_s25 }
  0xd1   : > { %v424_v1 = vpop.permute.xlu1 %423  ;;  %734 = vrot.lane.b32.xlu2 %v729_v34, %s1044_s28 }
  0xd2   : > { %v413_v33 = vpop.permute.xlu0 %412  ;;  %v429_v35 = vadd.f32 %v424_v1, %v416_v27 }
  0xd3   : > { %v417_v37 = vadd.f32 %v413_v33, %v404_v23  ;;  %v496_v5 = vpop.permute.xlu2 %495 }
  0xd5   : > { %v430_v40 = vadd.f32 %v426_v60, %v417_v37 }
  0xd7   : > { %754 = vrot.lane.b32.xlu1 %v749_v39, %s1042_s23 }
  0xd8   : > { %752 = vrot.lane.b32.xlu0 %v748_v25, %s1042_s23  ;;  %s946_s23 = sld [smem:[#allocation2 + $0x1e]] }
  0xd9   : > { %v439_v31 = vpop.permute.xlu1 %438  ;;  %765 = vrot.lane.b32.xlu2 %v761_v49, %s1041_s22 }
  0xda   : > { %v437_v48 = vpop.permute.xlu0 %436  ;;  %v443_v50 = vadd.f32 %v439_v31, %v430_v40 }
  0xdb   : > { %v442_v51 = vadd.f32 %v437_v48, %v429_v35  ;;  %v519_v56 = vpop.permute.xlu2 %518 }
  0xdc   : > { %v450_v21 = vadd.f32 %v448_v18, %v443_v50 }
  0xdd   : > { %v449_v54 = vadd.f32 %v447_v44, %v442_v51 }
  0xde   : > { %v565_v49 = vstv %s946_s23 }
  0xdf   : > { %v462_v55 = vadd.f32 %v457_v11, %v449_v54  ;;  %778 = vrot.lane.b32.xlu1 %v774_v52, %s1043_s25  ;;  %v567_v52 = vmul.f32 %v1222_v36, %v565_v49 }
  0xe0   : > { %767 = vrot.lane.b32.xlu0 %v762_v53, %s1041_s22  ;;  %s941_s22 = sld [smem:[#allocation2 + $0x19]] }
  0xe1   : > { %v470_v59 = vpop.permute.xlu1 %469  ;;  %780 = vrot.lane.b32.xlu2 %v775_v62, %s1043_s25  ;;  %s951_s25 = sld [smem:[#allocation2 + $0x23]] }
  0xe2   : > { %v459_v60 = vpop.permute.xlu0 %458  ;;  %v475_v63 = vadd.f32 %v470_v59, %v462_v55 }
  0xe3   : > { %v543_v2 = vpop.permute.xlu2 %542  ;;  %v463_v22 = vadd.f32 %v459_v60, %v450_v21 }
  0xe5   : > { %v476_v43 = vadd.f32 %v1311_v28, %v463_v22 }
  0xe6   : > { %v506_v30 = vstv %s941_s22 }
  0xe7   : > { %793 = vrot.lane.b32.xlu1 %v788_v0, %s1044_s28  ;;  %v508_v33 = vmul.f32 %v1199_v13, %v506_v30  ;;  %v507_v58 = vmul.f32 %v1186_v6, %v506_v30 }
  0xe8   : > { %791 = vrot.lane.b32.xlu0 %v787_v14, %s1044_s28  ;;  %v624_v14 = vstv %s951_s25  ;;  %s956_s28 = sld [smem:[#allocation2 + $0x28]] }
  0xe9   : > { %v485_v3 = vpop.permute.xlu1 %484 }
  0xea   : > { %v483_v4 = vpop.permute.xlu0 %482  ;;  %v489_v24 = vadd.f32 %v485_v3, %v476_v43 }
  0xeb   : > { %v558_v7 = vpop.permute.xlu2 %557  ;;  %v488_v26 = vadd.f32 %v483_v4, %v475_v63 }
  0xed   : > { %v501_v37 = vadd.f32 %v496_v5, %v488_v26  ;;  %v566_v5 = vmul.f32 %v1225_v38, %v565_v49  ;;  %v625_v38 = vmul.f32 %v1254_v17, %v624_v14 }
  0xef   : > { %v509_v25 = vadd.f32 %v507_v58, %v501_v37 }
  0xf1   : > { %v517_v16 = vpop.permute.xlu1 %516 }
  0xf2   : > { %v498_v8 = vpop.permute.xlu0 %497  ;;  %v522_v40 = vadd.f32 %v517_v16, %v509_v25  ;;  %v626_v16 = vmul.f32 %v1258_v19, %v624_v14 }
  0xf3   : > { %v589_v11 = vpop.permute.xlu2 %588  ;;  %v502_v1 = vadd.f32 %v498_v8, %v489_v24  ;;  %v683_v24 = vstv %s956_s28 }
  0xf4   : > { %v685_v17 = vmul.f32 %v1290_v61, %v683_v24  ;;  %v684_v19 = vmul.f32 %v1278_v47, %v683_v24 }
  0xf5   : > { %v510_v39 = vadd.f32 %v508_v33, %v502_v1 }
  0xf7   : > { %v523_v42 = vadd.f32 %v519_v56, %v510_v39 }
  0xf9   : > { %v532_v9 = vpop.permute.xlu1 %531 }
  0xfa   : > { %v530_v10 = vpop.permute.xlu0 %529  ;;  %v536_v46 = vadd.f32 %v532_v9, %v523_v42  ;;  %v742_v42 = vstv %s961_s21 }
  0xfb   : > { %v604_v20 = vpop.permute.xlu2 %603  ;;  %v535_v31 = vadd.f32 %v530_v10, %v522_v40  ;;  %v744_v47 = vmul.f32 %v1314_v29, %v742_v42 }
  0xfd   : > { %v548_v50 = vadd.f32 %v543_v2, %v535_v31 }
 0x101   : > { %v556_v12 = vpop.permute.xlu1 %555 }
 0x102   : > { %v545_v15 = vpop.permute.xlu0 %544  ;;  %v561_v51 = vadd.f32 %v556_v12, %v548_v50 }
 0x103   : > { %v635_v27 = vpop.permute.xlu2 %634  ;;  %v549_v48 = vadd.f32 %v545_v15, %v536_v46 }
 0x104   : > { %v568_v56 = vadd.f32 %v566_v5, %v561_v51 }
 0x105   : > { %v562_v13 = vadd.f32 %v558_v7, %v549_v48  ;;  %v743_v48 = vmul.f32 %v1317_v32, %v742_v42 }
 0x107   : > { %v569_v55 = vadd.f32 %v567_v52, %v562_v13 }
 0x109   : > { %v578_v41 = vpop.permute.xlu1 %577 }
 0x10a   : > { %v576_v23 = vpop.permute.xlu0 %575  ;;  %v582_v57 = vadd.f32 %v578_v41, %v569_v55 }
 0x10b   : > { %v650_v44 = vpop.permute.xlu2 %649  ;;  %v581_v59 = vadd.f32 %v576_v23, %v568_v56 }
 0x10d   : > { %v594_v0 = vadd.f32 %v589_v11, %v581_v59 }
 0x111   : > { %v602_v34 = vpop.permute.xlu1 %601 }
 0x112   : > { %v591_v35 = vpop.permute.xlu0 %590  ;;  %v607_v2 = vadd.f32 %v602_v34, %v594_v0 }
 0x113   : > { %v674_v54 = vpop.permute.xlu2 %673  ;;  %v595_v60 = vadd.f32 %v591_v35, %v582_v57 }
 0x115   : > { %v608_v3 = vadd.f32 %v604_v20, %v595_v60 }
 0x119   : > { %v617_v45 = vpop.permute.xlu1 %616 }
 0x11a   : > { %v615_v28 = vpop.permute.xlu0 %614  ;;  %v621_v7 = vadd.f32 %v617_v45, %v608_v3 }
 0x11b   : > { %v696_v4 = vpop.permute.xlu2 %695  ;;  %v620_v36 = vadd.f32 %v615_v28, %v607_v2 }
 0x11c   : > { %v628_v12 = vadd.f32 %v626_v16, %v621_v7 }
 0x11d   : > { %v627_v10 = vadd.f32 %v625_v38, %v620_v36 }
 0x11f   : > { %v640_v18 = vadd.f32 %v635_v27, %v627_v10 }
 0x121   : > { %v648_v6 = vpop.permute.xlu1 %647 }
 0x122   : > { %v637_v53 = vpop.permute.xlu0 %636  ;;  %v653_v22 = vadd.f32 %v648_v6, %v640_v18 }
 0x123   : > { %v641_v15 = vadd.f32 %v637_v53, %v628_v12  ;;  %v720_v21 = vpop.permute.xlu2 %719 }
 0x125   : > { %v654_v11 = vadd.f32 %v650_v44, %v641_v15 }
 0x129   : > { %v663_v62 = vpop.permute.xlu1 %662 }
 0x12a   : > { %v661_v63 = vpop.permute.xlu0 %660  ;;  %v667_v20 = vadd.f32 %v663_v62, %v654_v11 }
 0x12b   : > { %v666_v43 = vadd.f32 %v661_v63, %v653_v22  ;;  %v735_v33 = vpop.permute.xlu2 %734 }
 0x12d   : > { %v679_v30 = vadd.f32 %v674_v54, %v666_v43 }
 0x12f   : > { %v686_v27 = vadd.f32 %v684_v19, %v679_v30 }
 0x131   : > { %v694_v8 = vpop.permute.xlu1 %693 }
 0x132   : > { %v676_v9 = vpop.permute.xlu0 %675  ;;  %v699_v37 = vadd.f32 %v694_v8, %v686_v27 }
 0x133   : > { %v680_v26 = vadd.f32 %v676_v9, %v667_v20  ;;  %v766_v46 = vpop.permute.xlu2 %765 }
 0x135   : > { %v687_v1 = vadd.f32 %v685_v17, %v680_v26 }
 0x137   : > { %v700_v58 = vadd.f32 %v696_v4, %v687_v1 }
 0x139   : > { %v709_v41 = vpop.permute.xlu1 %708 }
 0x13a   : > { %v707_v23 = vpop.permute.xlu0 %706  ;;  %v713_v39 = vadd.f32 %v709_v41, %v700_v58 }
 0x13b   : > { %v712_v25 = vadd.f32 %v707_v23, %v699_v37  ;;  %v781_v53 = vpop.permute.xlu2 %780 }
 0x13d   : > { %v725_v28 = vadd.f32 %v720_v21, %v712_v25 }
 0x141   : > { %v733_v34 = vpop.permute.xlu1 %732 }
 0x142   : > { %v722_v35 = vpop.permute.xlu0 %721  ;;  %v738_v61 = vadd.f32 %v733_v34, %v725_v28 }
 0x143   : > { %v726_v40 = vadd.f32 %v722_v35, %v713_v39 }
 0x144   : > { %v745_v50 = vadd.f32 %v743_v48, %v738_v61 }
 0x145   : > { %v739_v31 = vadd.f32 %v735_v33, %v726_v40 }
 0x147   : > { %v746_v49 = vadd.f32 %v744_v47, %v739_v31 }
 0x149   : > { %v755_v44 = vpop.permute.xlu1 %754 }
 0x14a   : > { %v753_v45 = vpop.permute.xlu0 %752  ;;  %v759_v52 = vadd.f32 %v755_v44, %v746_v49 }
 0x14b   : > { %v758_v5 = vadd.f32 %v753_v45, %v745_v50 }
 0x14d   : > { %v771_v54 = vadd.f32 %v766_v46, %v758_v5 }
 0x151   : > { %v779_v51 = vpop.permute.xlu1 %778 }
 0x152   : > { %v768_v13 = vpop.permute.xlu0 %767  ;;  %v784_v55 = vadd.f32 %v779_v51, %v771_v54 }
 0x153   : > { %v772_v6 = vadd.f32 %v768_v13, %v759_v52 }
 0x155   : > { %v785_v56 = vadd.f32 %v781_v53, %v772_v6 }
 0x159   : > { %v794_v57 = vpop.permute.xlu1 %793 }
 0x15a   : > { %v792_v59 = vpop.permute.xlu0 %791  ;;  %v798_v60 = vadd.f32 %v794_v57, %v785_v56 }
 0x15b   : > { %v797_v62 = vadd.f32 %v792_v59, %v784_v55 }
 0x15c   : > { %v977_v63 = vmul.f32 -1.442695, %v798_v60 }
 0x15d   : > { %v976_v0 = vmul.f32 -1.442695, %v797_v62 }
 0x15e   : > { %1005 = vpow2.f32 %v977_v63 }
 0x15f   : > { %1007 = vpow2.f32 %v976_v0 }
 0x164   : > { %v1006_v29 = vpop.eup %1005 }
 0x165   : > { %v1008_v32 = vpop.eup %1007  ;;  %v806_v14 = vadd.f32 1.0, %v1006_v29 }
 0x166   : > { %v805_v2 = vadd.f32 1.0, %v1008_v32 }
 0x167   : > { %1009 = vrcp.f32 %v806_v14  ;;  %v833_v16 = vand.u32 2147483648, %v806_v14  ;;  %v831_v10 = vand.u32 2147483647, %v806_v14  ;;  %vm827_vm2 = vweird.f32 %v806_v14 }
 0x168   : > { %1011 = vrcp.f32 %v805_v2  ;;  %v818_v12 = vand.u32 2147483648, %v805_v2  ;;  %v816_v18 = vand.u32 2147483647, %v805_v2  ;;  %vm812_vm5 = vweird.f32 %v805_v2 }
 0x169   : > { %v834_v22 = vor.u32 1.1754944e-38, %v833_v16  ;;  %vm832_vm6 = vcmp.eq.f32.partialorder %v831_v10, 8.507059e+37 }
 0x16a   : > { %v819_v23 = vor.u32 1.1754944e-38, %v818_v12  ;;  %vm817_vm8 = vcmp.eq.f32.partialorder %v816_v18, 8.507059e+37 }
 0x16d   : > { %v1010_v3 = vpop.eup %1009 }
 0x16e   : > { %v1012_v4 = vpop.eup %1011  ;;  %v823_v7 = vmul.f32 %v1010_v3, %v806_v14  ;;  %vm828_vm0 = vweird.f32 %v1010_v3 }
 0x16f   : > { %v808_v36 = vmul.f32 %v1012_v4, %v805_v2  ;;  %vm813_vm1 = vweird.f32 %v1012_v4  ;;  %vm829_vm4 = vmor %vm827_vm2, %vm828_vm0 }
 0x170   : > { %v824_v38 = vsub.f32 1.0, %v823_v7  ;;  %vm814_vm7 = vmor %vm812_vm5, %vm813_vm1 }
 0x171   : > { %v809_v8 = vsub.f32 1.0, %v808_v36 }
 0x172   : > { %v825_v9 = vmul.f32 %v1010_v3, %v824_v38 }
 0x173   : > { %v810_v15 = vmul.f32 %v1012_v4, %v809_v8 }
 0x174   : > { %v826_v21 = vadd.f32 %v1010_v3, %v825_v9 }
 0x175   : > { %v811_v11 = vadd.f32 %v1012_v4, %v810_v15 }
 0x176   : > { %v830_v41 = vsel %vm829_vm4, %v1010_v3, %v826_v21 }
 0x177   : > { %v835_v20 = vsel %vm832_vm6, %v834_v22, %v830_v41  ;;  %v815_v43 = vsel %vm814_vm7, %v1012_v4, %v811_v11 }
 0x178   : > { %839 = vst.msk [vmem:[%s157_s29 + $0x8] sm:$0xff] %vm837_vm3, %v835_v20  ;;  %v820_v24 = vsel %vm817_vm8, %v819_v23, %v815_v43 }
 0x179   : > { %838 = vst.msk [vmem:[%s157_s29] sm:$0xff] %vm837_vm3, %v820_v24 }
 0x17a PF: > { %s13_s9 = sadd.s32 1, %s1038_s9  }
 0x17b   : > { %p10_p7 = scmp.ge.s32.totalorder %s13_s9, 4  }
 0x17d   :  { %12 = sbr.rel (!%p10_p7) target bundleno = 1 (0x1), region = 64 }
 0x182   :  { %861 = vsyncpa [#allocation3], 1 }
 0x183   :  { %863 = vsyncpa [#allocation3 + $0x1], 1 }

</bundles_post_ra>
